<compile_context>
chip_gen: v5e
topology: v5e:2x2
jax: 0.10.0
libtpu: 0.0.40
codegen_flags: <defaults>
</compile_context>

<pallas_src>
import jax
import jax.numpy as jnp
from jax.experimental import pallas as pl
from jax.experimental.pallas import tpu as pltpu

_LANE = 128
_XOFF = 8          # aligned column offset of the image inside the halo scratch


def _round_up(x, m):
    return (x + m - 1) // m * m


def _pick_tile_h(H, W8, requested):
    """Largest divisor of H <= requested (default targets ~2048 MXU rows per step)."""
    if requested is None:
        requested = max(8, -(-2048 // W8))
    requested = int(max(1, min(requested, H)))
    for d in range(requested, 0, -1):
        if H % d == 0:
            return d
    return 1


def _default_vmem_limit_bytes():
    # v5e/v6e: 128 MiB VMEM per core, v7x: 64 MiB.  Ask for ~85% of physical (headroom
    # for double buffers / compiler scratch) instead of a fixed 64 MiB.
    try:
        cap = pltpu.get_tpu_info().vmem_capacity_bytes
    except Exception:
        cap = 64 * 1024 * 1024
    return max(32 * 1024 * 1024, min(int(cap * 0.85), 110 * 1024 * 1024))


def _repvgg_kernel(x_hbm, w_ref, b_ref, o_ref, xpad_ref, sem_ref):
    """One (batch, row-strip) tile per grid step.

    x_hbm    : (N, H, W8, Cp)        full input, left in HBM (pl.ANY), manual strip DMA
    w_ref    : (9*Cp, Co)            reparameterized weights, rows ordered (dy, dx, cin)
    b_ref    : (1, Co)               folded-BN bias (3x3 + 1x1 branches), f32
    o_ref    : (1, TH, W8, Co)       output row strip
    xpad_ref : (1, TH+2, W8+16, Cp)  zero-bordered strip scratch (image at column _XOFF)
    sem_ref  : (3,)                  DMA semaphores (main strip, top halo, bottom halo)
    """
    n = pl.program_id(0)
    h = pl.program_id(1)
    n_h = pl.num_programs(1)

    _, TH, W8, Co = o_ref.shape
    _, THp2, Wp2, Cp = xpad_ref.shape
    H = x_hbm.shape[1]
    r0 = h * TH                      # first image row of this strip

    # ---- strip + halo rows: DMA straight from HBM into the scratch interior ----
    main_cp = pltpu.make_async_copy(
        x_hbm.at[pl.ds(n, 1), pl.ds(r0, TH), :, :],
        xpad_ref.at[:, pl.ds(1, TH), pl.ds(_XOFF, W8), :],
        sem_ref.at[0])
    top_cp = pltpu.make_async_copy(
        x_hbm.at[pl.ds(n, 1), pl.ds(jnp.maximum(r0 - 1, 0), 1), :, :],
        xpad_ref.at[:, pl.ds(0, 1), pl.ds(_XOFF, W8), :],
        sem_ref.at[1])
    bot_cp = pltpu.make_async_copy(
        x_hbm.at[pl.ds(n, 1), pl.ds(jnp.minimum(r0 + TH, H - 1), 1), :, :],
        xpad_ref.at[:, pl.ds(TH + 1, 1), pl.ds(_XOFF, W8), :],
        sem_ref.at[2])

    main_cp.start()

    @pl.when(h > 0)
    def _():
        top_cp.start()

    @pl.when(h < n_h - 1)
    def _():
        bot_cp.start()

    # ---- zero only what the DMAs do not cover (scratch persists across grid steps):
    #      left/right border columns every step, halo rows only at the image edges. ----
    dt = xpad_ref.dtype
    xpad_ref[:, :, 0:_XOFF, :] = jnp.zeros((1, THp2, _XOFF, Cp), dt)
    xpad_ref[:, :, _XOFF + W8:, :] = jnp.zeros((1, THp2, Wp2 - _XOFF - W8, Cp), dt)

    @pl.when(h == 0)                                  # top image border
    def _():
        xpad_ref[:, 0:1, _XOFF:_XOFF + W8, :] = jnp.zeros((1, 1, W8, Cp), dt)

    @pl.when(h == n_h - 1)                            # bottom image border
    def _():
        xpad_ref[:, TH + 1:TH + 2, _XOFF:_XOFF + W8, :] = jnp.zeros((1, 1, W8, Cp), dt)

    main_cp.wait()

    @pl.when(h > 0)
    def _():
        top_cp.wait()

    @pl.when(h < n_h - 1)
    def _():
        bot_cp.wait()

    # ---- 3x3 conv = 9 accumulated MXU matmuls (K = Cp) over shifted windows; no im2col ----
    acc = None
    for dy in range(3):
        for dx in range(3):
            c0 = _XOFF - 1 + dx
            lhs = xpad_ref[:, dy:dy + TH, c0:c0 + W8, :].reshape(TH * W8, Cp)
            t = dy * 3 + dx
            part = jnp.dot(lhs, w_ref[t * Cp:(t + 1) * Cp, :],
                           preferred_element_type=jnp.float32)
            acc = part if acc is None else acc + part

    y = jnp.maximum(acc + b_ref[...], 0.0)            # bias + ReLU in f32
    o_ref[...] = y.reshape(1, TH, W8, Co).astype(o_ref.dtype)


def _fuse_repvgg_params(params, eps=1e-5):
    """Fold BN into conv weights and merge the 1x1 branch into the 3x3 kernel
    (mathematically identical to RepVggBlock.get_equivalent_kernel_bias)."""

    def fuse(w, gamma, beta, mean, var):
        std = jnp.sqrt(var.astype(jnp.float32) + eps)
        t = gamma.astype(jnp.float32) / std
        return (w.astype(jnp.float32) * t.reshape(-1, 1, 1, 1),
                beta.astype(jnp.float32) - mean.astype(jnp.float32) * t)

    k3, b3 = fuse(params["w3"], params["bn3_gamma"], params["bn3_beta"],
                  params["bn3_mean"], params["bn3_var"])
    k1, b1 = fuse(params["w1"], params["bn1_gamma"], params["bn1_beta"],
                  params["bn1_mean"], params["bn1_var"])
    k_eq = k3.at[:, :, 1, 1].add(k1[:, :, 0, 0])      # pad 1x1 into the center 3x3 tap
    return k_eq, b3 + b1                              # (Cout, Cin, 3, 3), (Cout,)


def pack_repvgg_params(params, *, compute_dtype=jnp.bfloat16, eps=1e-5):
    """-> (w_flat (9*Cin_p, Cout_p) compute_dtype, bias (1, Cout_p) f32, c_in, c_out)."""
    k_eq, b_eq = _fuse_repvgg_params(params, eps)
    c_out, c_in = int(k_eq.shape[0]), int(k_eq.shape[1])
    cin_p, cout_p = _round_up(c_in, _LANE), _round_up(c_out, _LANE)
    w = jnp.transpose(k_eq, (2, 3, 1, 0))             # OIHW -> (3, 3, Cin, Cout)
    w = jnp.pad(w, ((0, 0), (0, 0), (0, cin_p - c_in), (0, cout_p - c_out)))
    w_flat = w.reshape(9 * cin_p, cout_p).astype(compute_dtype)
    bias = jnp.pad(b_eq, (0, cout_p - c_out)).reshape(1, cout_p).astype(jnp.float32)
    return w_flat, bias, c_in, c_out


def repvgg_block_nhwc(x_nhwc, w_flat, bias, *, tile_h=None, out_dtype=None,
                      vmem_limit_bytes=None):
    """RepVggBlock on channel/width padded NHWC activations (use this for chained blocks).

    x_nhwc : (N, H, W8, Cp)  W8 % 8 == 0, Cp % 128 == 0, compute dtype
    w_flat : (9*Cp, Cop)     packed reparameterized weights (see pack_repvgg_params)
    bias   : (1, Cop)        f32
    Returns (N, H, W8, Cop) in out_dtype (default: x_nhwc.dtype).
    """
    N, H, W8, cin_p = x_nhwc.shape
    cout_p = w_flat.shape[1]
    assert W8 % 8 == 0 and cin_p % _LANE == 0 and cout_p % _LANE == 0
    assert w_flat.shape[0] == 9 * cin_p
    out_dtype = x_nhwc.dtype if out_dtype is None else out_dtype

    tile_h = _pick_tile_h(H, W8, tile_h)
    n_h = H // tile_h
    if vmem_limit_bytes is None:
        vmem_limit_bytes = _default_vmem_limit_bytes()

    return pl.pallas_call(
        _repvgg_kernel,
        out_shape=jax.ShapeDtypeStruct((N, H, W8, cout_p), out_dtype),
        grid_spec=pltpu.PrefetchScalarGridSpec(
            num_scalar_prefetch=0,
            grid=(N, n_h),
            in_specs=[
                pl.BlockSpec(memory_space=pl.ANY),                        # x stays in HBM
                pl.BlockSpec((9 * cin_p, cout_p), lambda n, h: (0, 0)),   # weights, resident
                pl.BlockSpec((1, cout_p), lambda n, h: (0, 0)),           # bias, resident
            ],
            out_specs=pl.BlockSpec((1, tile_h, W8, cout_p),
                                   lambda n, h: (n, h, 0, 0)),
            scratch_shapes=[
                pltpu.VMEM((1, tile_h + 2, W8 + 2 * _XOFF, cin_p), x_nhwc.dtype),
                pltpu.SemaphoreType.DMA((3,)),
            ],
        ),
        compiler_params=pltpu.CompilerParams(
            dimension_semantics=("parallel", "parallel"),
            vmem_limit_bytes=vmem_limit_bytes,
        ),
    )(x_nhwc, w_flat, bias)


def repvgg_block(x_nchw, params, *, tile_h=None, compute_dtype=jnp.bfloat16):
    """RepVggBlock forward, NCHW in -> NCHW float32 out (matches the torch module)."""
    N, c_in, H, W = x_nchw.shape
    w_flat, bias, c_in_w, c_out = pack_repvgg_params(params, compute_dtype=compute_dtype)
    assert c_in_w == c_in
    cin_p = _round_up(c_in, _LANE)
    W8 = _round_up(W, 8)

    # NCHW -> NHWC (channels on the lane axis), pad W to a sublane multiple and channels
    # to the lane width.  Chained blocks should stay in this layout (repvgg_block_nhwc).
    x = jnp.transpose(x_nchw, (0, 2, 3, 1))
    x = jnp.pad(x, ((0, 0), (0, 0), (0, W8 - W), (0, cin_p - c_in)))
    x = x.astype(compute_dtype)

    y = repvgg_block_nhwc(x, w_flat, bias, tile_h=tile_h)
    y = y[:, :, :W, :c_out]                     # drop width / channel padding
    return jnp.transpose(y, (0, 3, 1, 2)).astype(jnp.float32)


def _reference(x_nchw, params):
    """Pure-JAX reference (lax conv, per-branch BN) for correctness checking."""
    eps = 1e-5
    x = x_nchw.astype(jnp.float32)

    def branch(w, gamma, beta, mean, var, pad):
        y = jax.lax.conv_general_dilated(
            x, w.astype(jnp.float32), window_strides=(1, 1),
            padding=[(pad, pad), (pad, pad)],
            dimension_numbers=("NCHW", "OIHW", "NCHW"),
            precision=jax.lax.Precision.HIGHEST)
        scale = (gamma / jnp.sqrt(var + eps)).reshape(1, -1, 1, 1)
        bias = (beta - mean * gamma / jnp.sqrt(var + eps)).reshape(1, -1, 1, 1)
        return y * scale + bias

    y = (branch(params["w3"], params["bn3_gamma"], params["bn3_beta"],
                params["bn3_mean"], params["bn3_var"], 1)
         + branch(params["w1"], params["bn1_gamma"], params["bn1_beta"],
                  params["bn1_mean"], params["bn1_var"], 0))
    return jnp.maximum(y, 0.0)


def _init_params(key, ch_in, ch_out):
    ks = jax.random.split(key, 10)
    return {
        "w3": jax.random.normal(ks[0], (ch_out, ch_in, 3, 3), jnp.float32) * 0.2,
        "w1": jax.random.normal(ks[1], (ch_out, ch_in, 1, 1), jnp.float32) * 0.2,
        "bn3_gamma": 1.0 + 0.1 * jax.random.normal(ks[2], (ch_out,), jnp.float32),
        "bn3_beta": 0.1 * jax.random.normal(ks[3], (ch_out,), jnp.float32),
        "bn3_mean": 0.1 * jax.random.normal(ks[4], (ch_out,), jnp.float32),
        "bn3_var": jnp.abs(jax.random.normal(ks[5], (ch_out,), jnp.float32)) + 0.5,
        "bn1_gamma": 1.0 + 0.1 * jax.random.normal(ks[6], (ch_out,), jnp.float32),
        "bn1_beta": 0.1 * jax.random.normal(ks[7], (ch_out,), jnp.float32),
        "bn1_mean": 0.1 * jax.random.normal(ks[8], (ch_out,), jnp.float32),
        "bn1_var": jnp.abs(jax.random.normal(ks[9], (ch_out,), jnp.float32)) + 0.5,
    }


if __name__ == "__main__":
    key = jax.random.PRNGKey(0)
    k_x, k_p, k_x2 = jax.random.split(key, 3)

    N, C_IN, C_OUT, H, W = 2, 4, 8, 16, 16
    x = jax.random.normal(k_x, (N, C_IN, H, W), jnp.float32)
    params = _init_params(k_p, C_IN, C_OUT)
    ref = jax.block_until_ready(_reference(x, params))

    # float32 path, tile_h=8 so the halo-row DMAs are exercised (n_h = 2).
    out = jax.block_until_ready(
        repvgg_block(x, params, tile_h=8, compute_dtype=jnp.float32))
    assert out.shape == (N, C_OUT, H, W), out.shape
    assert jnp.allclose(out, ref, atol=2e-3, rtol=2e-3), \
        float(jnp.max(jnp.abs(out - ref)))

    # bfloat16 compute path (default), automatic tile size; f32 MXU accumulation.
    out_bf16 = jax.block_until_ready(repvgg_block(x, params))
    assert jnp.allclose(out_bf16, ref, atol=1e-1, rtol=1e-1), \
        float(jnp.max(jnp.abs(out_bf16 - ref)))

    # Ragged spatial shape (W not a multiple of 8, H not divisible by the requested
    # tile): exercises the wrapper W-padding and the divisor-based tile_h selection.
    x2 = jax.random.normal(k_x2, (1, C_IN, 10, 10), jnp.float32)
    ref2 = jax.block_until_ready(_reference(x2, params))
    out2 = jax.block_until_ready(
        repvgg_block(x2, params, tile_h=8, compute_dtype=jnp.float32))
    assert out2.shape == (1, C_OUT, 10, 10), out2.shape
    assert jnp.allclose(out2, ref2, atol=2e-3, rtol=2e-3), \
        float(jnp.max(jnp.abs(out2 - ref2)))

    print("KERNEL_OK")
</pallas_src>

<mosaic_0001>
module attributes {stable_mosaic.version = 11 : i64} {
  func.func @_repvgg_kernel(%arg0: i32, %arg1: i32, %arg2: memref<2x16x16x128xf32, #tpu.memory_space<any>>, %arg3: memref<1152x128xf32, #tpu.memory_space<vmem>>, %arg4: memref<1x128xf32, #tpu.memory_space<vmem>>, %arg5: memref<1x8x16x128xf32, #tpu.memory_space<vmem>>, %arg6: memref<1x10x32x128xf32, #tpu.memory_space<vmem>>, %arg7: memref<3x!tpu.dma_semaphore, #tpu.memory_space<semaphore_mem>>) attributes {dimension_semantics = [#tpu.dimension_semantics<parallel>, #tpu.dimension_semantics<parallel>], iteration_bounds = array<i64: 2, 2>, scalar_prefetch = 0 : i64, scratch_operands = 2 : i64, tpu.core_type = #tpu.core_type<tc>, window_params = [{}, {pipeline_mode = #tpu.pipeline_mode<synchronous>, transform_indices = @transform_1, window_bounds = array<i64: 1152, 128>}, {pipeline_mode = #tpu.pipeline_mode<synchronous>, transform_indices = @transform_2, window_bounds = array<i64: 1, 128>}, {transform_indices = @transform_3, window_bounds = array<i64: 1, 8, 16, 128>}]} {
    %c8_i32 = arith.constant 8 : i32
    %0 = arith.muli %arg1, %c8_i32 : i32
    %c1_i32 = arith.constant 1 : i32
    %1 = arith.subi %0, %c1_i32 : i32
    %c0_i32 = arith.constant 0 : i32
    %2 = arith.maxsi %1, %c0_i32 : i32
    %c8_i32_0 = arith.constant 8 : i32
    %3 = arith.addi %0, %c8_i32_0 : i32
    %c15_i32 = arith.constant 15 : i32
    %4 = arith.minsi %3, %c15_i32 : i32
    %c0_i32_1 = arith.constant 0 : i32
    %c0_i32_2 = arith.constant 0 : i32
    %c0_i32_3 = arith.constant 0 : i32
    %5 = tpu.memref_slice %arg2[%arg0, %0, %c0_i32_2, %c0_i32_3] : memref<2x16x16x128xf32, #tpu.memory_space<any>> -> memref<1x8x16x128xf32, #tpu.memory_space<any>>
    %c0_i32_4 = arith.constant 0 : i32
    %c1_i32_5 = arith.constant 1 : i32
    %c8_i32_6 = arith.constant 8 : i32
    %c0_i32_7 = arith.constant 0 : i32
    %6 = tpu.memref_slice %arg6[%c0_i32_4, %c1_i32_5, %c8_i32_6, %c0_i32_7] : memref<1x10x32x128xf32, #tpu.memory_space<vmem>> -> memref<1x8x16x128xf32, #tpu.memory_space<vmem>>
    %7 = tpu.memref_slice %arg7[%c0_i32_1] : memref<3x!tpu.dma_semaphore, #tpu.memory_space<semaphore_mem>> -> memref<1x!tpu.dma_semaphore, #tpu.memory_space<semaphore_mem>>
    %8 = tpu.memref_squeeze %7 : memref<1x!tpu.dma_semaphore, #tpu.memory_space<semaphore_mem>> -> memref<!tpu.dma_semaphore, #tpu.memory_space<semaphore_mem>>
    tpu.enqueue_dma source(%5 : memref<1x8x16x128xf32, #tpu.memory_space<any>>) target(%6 : memref<1x8x16x128xf32, #tpu.memory_space<vmem>>) target_semaphore(%8 : memref<!tpu.dma_semaphore, #tpu.memory_space<semaphore_mem>>)
    %c0_i32_8 = arith.constant 0 : i32
    %9 = arith.cmpi sgt, %arg1, %c0_i32_8 : i32
    %10 = arith.extui %9 : i1 to i32
    %c1_i32_9 = arith.constant 1 : i32
    %c0_i32_10 = arith.constant 0 : i32
    %11 = arith.cmpi ne, %10, %c0_i32_10 : i32
    scf.if %11 {
      %c0_i32_94 = arith.constant 0 : i32
      %c0_i32_95 = arith.constant 0 : i32
      %86 = tpu.memref_slice %arg2[%arg0, %2, %c0_i32_94, %c0_i32_95] : memref<2x16x16x128xf32, #tpu.memory_space<any>> -> memref<1x1x16x128xf32, #tpu.memory_space<any>>
      %c0_i32_96 = arith.constant 0 : i32
      %c0_i32_97 = arith.constant 0 : i32
      %c8_i32_98 = arith.constant 8 : i32
      %c0_i32_99 = arith.constant 0 : i32
      %87 = tpu.memref_slice %arg6[%c0_i32_96, %c0_i32_97, %c8_i32_98, %c0_i32_99] : memref<1x10x32x128xf32, #tpu.memory_space<vmem>> -> memref<1x1x16x128xf32, #tpu.memory_space<vmem>>
      %88 = tpu.memref_slice %arg7[%c1_i32_9] : memref<3x!tpu.dma_semaphore, #tpu.memory_space<semaphore_mem>> -> memref<1x!tpu.dma_semaphore, #tpu.memory_space<semaphore_mem>>
      %89 = tpu.memref_squeeze %88 : memref<1x!tpu.dma_semaphore, #tpu.memory_space<semaphore_mem>> -> memref<!tpu.dma_semaphore, #tpu.memory_space<semaphore_mem>>
      tpu.enqueue_dma source(%86 : memref<1x1x16x128xf32, #tpu.memory_space<any>>) target(%87 : memref<1x1x16x128xf32, #tpu.memory_space<vmem>>) target_semaphore(%89 : memref<!tpu.dma_semaphore, #tpu.memory_space<semaphore_mem>>)
    } else {
    }
    %c1_i32_11 = arith.constant 1 : i32
    %12 = arith.cmpi slt, %arg1, %c1_i32_11 : i32
    %13 = arith.extui %12 : i1 to i32
    %c2_i32 = arith.constant 2 : i32
    %c0_i32_12 = arith.constant 0 : i32
    %14 = arith.cmpi ne, %13, %c0_i32_12 : i32
    scf.if %14 {
      %c0_i32_94 = arith.constant 0 : i32
      %c0_i32_95 = arith.constant 0 : i32
      %86 = tpu.memref_slice %arg2[%arg0, %4, %c0_i32_94, %c0_i32_95] : memref<2x16x16x128xf32, #tpu.memory_space<any>> -> memref<1x1x16x128xf32, #tpu.memory_space<any>>
      %c0_i32_96 = arith.constant 0 : i32
      %c9_i32 = arith.constant 9 : i32
      %c8_i32_97 = arith.constant 8 : i32
      %c0_i32_98 = arith.constant 0 : i32
      %87 = tpu.memref_slice %arg6[%c0_i32_96, %c9_i32, %c8_i32_97, %c0_i32_98] : memref<1x10x32x128xf32, #tpu.memory_space<vmem>> -> memref<1x1x16x128xf32, #tpu.memory_space<vmem>>
      %88 = tpu.memref_slice %arg7[%c2_i32] : memref<3x!tpu.dma_semaphore, #tpu.memory_space<semaphore_mem>> -> memref<1x!tpu.dma_semaphore, #tpu.memory_space<semaphore_mem>>
      %89 = tpu.memref_squeeze %88 : memref<1x!tpu.dma_semaphore, #tpu.memory_space<semaphore_mem>> -> memref<!tpu.dma_semaphore, #tpu.memory_space<semaphore_mem>>
      tpu.enqueue_dma source(%86 : memref<1x1x16x128xf32, #tpu.memory_space<any>>) target(%87 : memref<1x1x16x128xf32, #tpu.memory_space<vmem>>) target_semaphore(%89 : memref<!tpu.dma_semaphore, #tpu.memory_space<semaphore_mem>>)
    } else {
    }
    %cst = arith.constant 0.000000e+00 : f32
    %15 = vector.broadcast %cst : f32 to vector<1x10x8x128xf32>
    %c0 = arith.constant 0 : index
    %c0_13 = arith.constant 0 : index
    %c0_14 = arith.constant 0 : index
    %c0_15 = arith.constant 0 : index
    %16 = vector.load %arg6[%c0, %c0_13, %c0_14, %c0_15] : memref<1x10x32x128xf32, #tpu.memory_space<vmem>>, vector<1x10x8x128xf32>
    tpu.vector_store %arg6[%c0, %c0_13, %c0_14, %c0_15], %15 {strides = array<i32>} : memref<1x10x32x128xf32, #tpu.memory_space<vmem>>, vector<1x10x8x128xf32>,
    %cst_16 = arith.constant 0.000000e+00 : f32
    %17 = vector.broadcast %cst_16 : f32 to vector<1x10x8x128xf32>
    %c0_17 = arith.constant 0 : index
    %c0_18 = arith.constant 0 : index
    %c24 = arith.constant 24 : index
    %c0_19 = arith.constant 0 : index
    %18 = vector.load %arg6[%c0_17, %c0_18, %c24, %c0_19] : memref<1x10x32x128xf32, #tpu.memory_space<vmem>>, vector<1x10x8x128xf32>
    tpu.vector_store %arg6[%c0_17, %c0_18, %c24, %c0_19], %17 {strides = array<i32>} : memref<1x10x32x128xf32, #tpu.memory_space<vmem>>, vector<1x10x8x128xf32>,
    %c0_i32_20 = arith.constant 0 : i32
    %19 = arith.cmpi eq, %arg1, %c0_i32_20 : i32
    %20 = arith.extui %19 : i1 to i32
    %c0_i32_21 = arith.constant 0 : i32
    %21 = arith.cmpi ne, %20, %c0_i32_21 : i32
    scf.if %21 {
      %cst_94 = arith.constant 0.000000e+00 : f32
      %86 = vector.broadcast %cst_94 : f32 to vector<1x1x16x128xf32>
      %c0_95 = arith.constant 0 : index
      %c0_96 = arith.constant 0 : index
      %c8_97 = arith.constant 8 : index
      %c0_98 = arith.constant 0 : index
      %87 = vector.load %arg6[%c0_95, %c0_96, %c8_97, %c0_98] : memref<1x10x32x128xf32, #tpu.memory_space<vmem>>, vector<1x1x16x128xf32>
      tpu.vector_store %arg6[%c0_95, %c0_96, %c8_97, %c0_98], %86 {strides = array<i32>} : memref<1x10x32x128xf32, #tpu.memory_space<vmem>>, vector<1x1x16x128xf32>,
    } else {
    }
    %c1_i32_22 = arith.constant 1 : i32
    %22 = arith.cmpi eq, %arg1, %c1_i32_22 : i32
    %23 = arith.extui %22 : i1 to i32
    %c0_i32_23 = arith.constant 0 : i32
    %24 = arith.cmpi ne, %23, %c0_i32_23 : i32
    scf.if %24 {
      %cst_94 = arith.constant 0.000000e+00 : f32
      %86 = vector.broadcast %cst_94 : f32 to vector<1x1x16x128xf32>
      %c0_95 = arith.constant 0 : index
      %c9_96 = arith.constant 9 : index
      %c8_97 = arith.constant 8 : index
      %c0_98 = arith.constant 0 : index
      %87 = vector.load %arg6[%c0_95, %c9_96, %c8_97, %c0_98] : memref<1x10x32x128xf32, #tpu.memory_space<vmem>>, vector<1x1x16x128xf32>
      tpu.vector_store %arg6[%c0_95, %c9_96, %c8_97, %c0_98], %86 {strides = array<i32>} : memref<1x10x32x128xf32, #tpu.memory_space<vmem>>, vector<1x1x16x128xf32>,
    } else {
    }
    %c0_i32_24 = arith.constant 0 : i32
    %c0_i32_25 = arith.constant 0 : i32
    %c0_i32_26 = arith.constant 0 : i32
    %25 = tpu.memref_slice %arg2[%arg0, %0, %c0_i32_25, %c0_i32_26] : memref<2x16x16x128xf32, #tpu.memory_space<any>> -> memref<1x8x16x128xf32, #tpu.memory_space<any>>
    %c0_i32_27 = arith.constant 0 : i32
    %c1_i32_28 = arith.constant 1 : i32
    %c8_i32_29 = arith.constant 8 : i32
    %c0_i32_30 = arith.constant 0 : i32
    %26 = tpu.memref_slice %arg6[%c0_i32_27, %c1_i32_28, %c8_i32_29, %c0_i32_30] : memref<1x10x32x128xf32, #tpu.memory_space<vmem>> -> memref<1x8x16x128xf32, #tpu.memory_space<vmem>>
    %27 = tpu.memref_slice %arg7[%c0_i32_24] : memref<3x!tpu.dma_semaphore, #tpu.memory_space<semaphore_mem>> -> memref<1x!tpu.dma_semaphore, #tpu.memory_space<semaphore_mem>>
    %28 = tpu.memref_squeeze %27 : memref<1x!tpu.dma_semaphore, #tpu.memory_space<semaphore_mem>> -> memref<!tpu.dma_semaphore, #tpu.memory_space<semaphore_mem>>
    tpu.wait_dma2 semaphore(%28 : memref<!tpu.dma_semaphore, #tpu.memory_space<semaphore_mem>>) src(%25 : memref<1x8x16x128xf32, #tpu.memory_space<any>>) dst(%26 : memref<1x8x16x128xf32, #tpu.memory_space<vmem>>)
    %c0_i32_31 = arith.constant 0 : i32
    %29 = arith.cmpi sgt, %arg1, %c0_i32_31 : i32
    %30 = arith.extui %29 : i1 to i32
    %c1_i32_32 = arith.constant 1 : i32
    %c0_i32_33 = arith.constant 0 : i32
    %31 = arith.cmpi ne, %30, %c0_i32_33 : i32
    scf.if %31 {
      %c0_i32_94 = arith.constant 0 : i32
      %c0_i32_95 = arith.constant 0 : i32
      %86 = tpu.memref_slice %arg2[%arg0, %2, %c0_i32_94, %c0_i32_95] : memref<2x16x16x128xf32, #tpu.memory_space<any>> -> memref<1x1x16x128xf32, #tpu.memory_space<any>>
      %c0_i32_96 = arith.constant 0 : i32
      %c0_i32_97 = arith.constant 0 : i32
      %c8_i32_98 = arith.constant 8 : i32
      %c0_i32_99 = arith.constant 0 : i32
      %87 = tpu.memref_slice %arg6[%c0_i32_96, %c0_i32_97, %c8_i32_98, %c0_i32_99] : memref<1x10x32x128xf32, #tpu.memory_space<vmem>> -> memref<1x1x16x128xf32, #tpu.memory_space<vmem>>
      %88 = tpu.memref_slice %arg7[%c1_i32_32] : memref<3x!tpu.dma_semaphore, #tpu.memory_space<semaphore_mem>> -> memref<1x!tpu.dma_semaphore, #tpu.memory_space<semaphore_mem>>
      %89 = tpu.memref_squeeze %88 : memref<1x!tpu.dma_semaphore, #tpu.memory_space<semaphore_mem>> -> memref<!tpu.dma_semaphore, #tpu.memory_space<semaphore_mem>>
      tpu.wait_dma2 semaphore(%89 : memref<!tpu.dma_semaphore, #tpu.memory_space<semaphore_mem>>) src(%86 : memref<1x1x16x128xf32, #tpu.memory_space<any>>) dst(%87 : memref<1x1x16x128xf32, #tpu.memory_space<vmem>>)
    } else {
    }
    %c1_i32_34 = arith.constant 1 : i32
    %32 = arith.cmpi slt, %arg1, %c1_i32_34 : i32
    %33 = arith.extui %32 : i1 to i32
    %c2_i32_35 = arith.constant 2 : i32
    %c0_i32_36 = arith.constant 0 : i32
    %34 = arith.cmpi ne, %33, %c0_i32_36 : i32
    scf.if %34 {
      %c0_i32_94 = arith.constant 0 : i32
      %c0_i32_95 = arith.constant 0 : i32
      %86 = tpu.memref_slice %arg2[%arg0, %4, %c0_i32_94, %c0_i32_95] : memref<2x16x16x128xf32, #tpu.memory_space<any>> -> memref<1x1x16x128xf32, #tpu.memory_space<any>>
      %c0_i32_96 = arith.constant 0 : i32
      %c9_i32 = arith.constant 9 : i32
      %c8_i32_97 = arith.constant 8 : i32
      %c0_i32_98 = arith.constant 0 : i32
      %87 = tpu.memref_slice %arg6[%c0_i32_96, %c9_i32, %c8_i32_97, %c0_i32_98] : memref<1x10x32x128xf32, #tpu.memory_space<vmem>> -> memref<1x1x16x128xf32, #tpu.memory_space<vmem>>
      %88 = tpu.memref_slice %arg7[%c2_i32_35] : memref<3x!tpu.dma_semaphore, #tpu.memory_space<semaphore_mem>> -> memref<1x!tpu.dma_semaphore, #tpu.memory_space<semaphore_mem>>
      %89 = tpu.memref_squeeze %88 : memref<1x!tpu.dma_semaphore, #tpu.memory_space<semaphore_mem>> -> memref<!tpu.dma_semaphore, #tpu.memory_space<semaphore_mem>>
      tpu.wait_dma2 semaphore(%89 : memref<!tpu.dma_semaphore, #tpu.memory_space<semaphore_mem>>) src(%86 : memref<1x1x16x128xf32, #tpu.memory_space<any>>) dst(%87 : memref<1x1x16x128xf32, #tpu.memory_space<vmem>>)
    } else {
    }
    %c0_37 = arith.constant 0 : index
    %c0_38 = arith.constant 0 : index
    %c7 = arith.constant 7 : index
    %c0_39 = arith.constant 0 : index
    %35 = vector.load %arg6[%c0_37, %c0_38, %c7, %c0_39] : memref<1x10x32x128xf32, #tpu.memory_space<vmem>>, vector<1x8x16x128xf32>
    %36 = vector.shape_cast %35 : vector<1x8x16x128xf32> to vector<128x128xf32>
    %c0_40 = arith.constant 0 : index
    %c0_41 = arith.constant 0 : index
    %37 = vector.load %arg3[%c0_40, %c0_41] : memref<1152x128xf32, #tpu.memory_space<vmem>>, vector<128x128xf32>
    %cst_42 = arith.constant dense<0.000000e+00> : vector<128x128xf32>
    %38 = tpu.matmul %36, %37, %cst_42 {dimension_numbers = #tpu.dot_dimension_numbers<[1], [0], [0], [1], [0, 0, 1, 1], [], []>} : vector<128x128xf32>, vector<128x128xf32>, vector<128x128xf32> -> vector<128x128xf32>
    %c0_43 = arith.constant 0 : index
    %c0_44 = arith.constant 0 : index
    %c8 = arith.constant 8 : index
    %c0_45 = arith.constant 0 : index
    %39 = vector.load %arg6[%c0_43, %c0_44, %c8, %c0_45] : memref<1x10x32x128xf32, #tpu.memory_space<vmem>>, vector<1x8x16x128xf32>
    %40 = vector.shape_cast %39 : vector<1x8x16x128xf32> to vector<128x128xf32>
    %c128 = arith.constant 128 : index
    %c0_46 = arith.constant 0 : index
    %41 = vector.load %arg3[%c128, %c0_46] : memref<1152x128xf32, #tpu.memory_space<vmem>>, vector<128x128xf32>
    %cst_47 = arith.constant dense<0.000000e+00> : vector<128x128xf32>
    %42 = tpu.matmul %40, %41, %cst_47 {dimension_numbers = #tpu.dot_dimension_numbers<[1], [0], [0], [1], [0, 0, 1, 1], [], []>} : vector<128x128xf32>, vector<128x128xf32>, vector<128x128xf32> -> vector<128x128xf32>
    %43 = arith.addf %38, %42 : vector<128x128xf32>
    %c0_48 = arith.constant 0 : index
    %c0_49 = arith.constant 0 : index
    %c9 = arith.constant 9 : index
    %c0_50 = arith.constant 0 : index
    %44 = vector.load %arg6[%c0_48, %c0_49, %c9, %c0_50] : memref<1x10x32x128xf32, #tpu.memory_space<vmem>>, vector<1x8x16x128xf32>
    %45 = vector.shape_cast %44 : vector<1x8x16x128xf32> to vector<128x128xf32>
    %c256 = arith.constant 256 : index
    %c0_51 = arith.constant 0 : index
    %46 = vector.load %arg3[%c256, %c0_51] : memref<1152x128xf32, #tpu.memory_space<vmem>>, vector<128x128xf32>
    %cst_52 = arith.constant dense<0.000000e+00> : vector<128x128xf32>
    %47 = tpu.matmul %45, %46, %cst_52 {dimension_numbers = #tpu.dot_dimension_numbers<[1], [0], [0], [1], [0, 0, 1, 1], [], []>} : vector<128x128xf32>, vector<128x128xf32>, vector<128x128xf32> -> vector<128x128xf32>
    %48 = arith.addf %43, %47 : vector<128x128xf32>
    %c0_53 = arith.constant 0 : index
    %c1 = arith.constant 1 : index
    %c7_54 = arith.constant 7 : index
    %c0_55 = arith.constant 0 : index
    %49 = vector.load %arg6[%c0_53, %c1, %c7_54, %c0_55] : memref<1x10x32x128xf32, #tpu.memory_space<vmem>>, vector<1x8x16x128xf32>
    %50 = vector.shape_cast %49 : vector<1x8x16x128xf32> to vector<128x128xf32>
    %c384 = arith.constant 384 : index
    %c0_56 = arith.constant 0 : index
    %51 = vector.load %arg3[%c384, %c0_56] : memref<1152x128xf32, #tpu.memory_space<vmem>>, vector<128x128xf32>
    %cst_57 = arith.constant dense<0.000000e+00> : vector<128x128xf32>
    %52 = tpu.matmul %50, %51, %cst_57 {dimension_numbers = #tpu.dot_dimension_numbers<[1], [0], [0], [1], [0, 0, 1, 1], [], []>} : vector<128x128xf32>, vector<128x128xf32>, vector<128x128xf32> -> vector<128x128xf32>
    %53 = arith.addf %48, %52 : vector<128x128xf32>
    %c0_58 = arith.constant 0 : index
    %c1_59 = arith.constant 1 : index
    %c8_60 = arith.constant 8 : index
    %c0_61 = arith.constant 0 : index
    %54 = vector.load %arg6[%c0_58, %c1_59, %c8_60, %c0_61] : memref<1x10x32x128xf32, #tpu.memory_space<vmem>>, vector<1x8x16x128xf32>
    %55 = vector.shape_cast %54 : vector<1x8x16x128xf32> to vector<128x128xf32>
    %c512 = arith.constant 512 : index
    %c0_62 = arith.constant 0 : index
    %56 = vector.load %arg3[%c512, %c0_62] : memref<1152x128xf32, #tpu.memory_space<vmem>>, vector<128x128xf32>
    %cst_63 = arith.constant dense<0.000000e+00> : vector<128x128xf32>
    %57 = tpu.matmul %55, %56, %cst_63 {dimension_numbers = #tpu.dot_dimension_numbers<[1], [0], [0], [1], [0, 0, 1, 1], [], []>} : vector<128x128xf32>, vector<128x128xf32>, vector<128x128xf32> -> vector<128x128xf32>
    %58 = arith.addf %53, %57 : vector<128x128xf32>
    %c0_64 = arith.constant 0 : index
    %c1_65 = arith.constant 1 : index
    %c9_66 = arith.constant 9 : index
    %c0_67 = arith.constant 0 : index
    %59 = vector.load %arg6[%c0_64, %c1_65, %c9_66, %c0_67] : memref<1x10x32x128xf32, #tpu.memory_space<vmem>>, vector<1x8x16x128xf32>
    %60 = vector.shape_cast %59 : vector<1x8x16x128xf32> to vector<128x128xf32>
    %c640 = arith.constant 640 : index
    %c0_68 = arith.constant 0 : index
    %61 = vector.load %arg3[%c640, %c0_68] : memref<1152x128xf32, #tpu.memory_space<vmem>>, vector<128x128xf32>
    %cst_69 = arith.constant dense<0.000000e+00> : vector<128x128xf32>
    %62 = tpu.matmul %60, %61, %cst_69 {dimension_numbers = #tpu.dot_dimension_numbers<[1], [0], [0], [1], [0, 0, 1, 1], [], []>} : vector<128x128xf32>, vector<128x128xf32>, vector<128x128xf32> -> vector<128x128xf32>
    %63 = arith.addf %58, %62 : vector<128x128xf32>
    %c0_70 = arith.constant 0 : index
    %c2 = arith.constant 2 : index
    %c7_71 = arith.constant 7 : index
    %c0_72 = arith.constant 0 : index
    %64 = vector.load %arg6[%c0_70, %c2, %c7_71, %c0_72] : memref<1x10x32x128xf32, #tpu.memory_space<vmem>>, vector<1x8x16x128xf32>
    %65 = vector.shape_cast %64 : vector<1x8x16x128xf32> to vector<128x128xf32>
    %c768 = arith.constant 768 : index
    %c0_73 = arith.constant 0 : index
    %66 = vector.load %arg3[%c768, %c0_73] : memref<1152x128xf32, #tpu.memory_space<vmem>>, vector<128x128xf32>
    %cst_74 = arith.constant dense<0.000000e+00> : vector<128x128xf32>
    %67 = tpu.matmul %65, %66, %cst_74 {dimension_numbers = #tpu.dot_dimension_numbers<[1], [0], [0], [1], [0, 0, 1, 1], [], []>} : vector<128x128xf32>, vector<128x128xf32>, vector<128x128xf32> -> vector<128x128xf32>
    %68 = arith.addf %63, %67 : vector<128x128xf32>
    %c0_75 = arith.constant 0 : index
    %c2_76 = arith.constant 2 : index
    %c8_77 = arith.constant 8 : index
    %c0_78 = arith.constant 0 : index
    %69 = vector.load %arg6[%c0_75, %c2_76, %c8_77, %c0_78] : memref<1x10x32x128xf32, #tpu.memory_space<vmem>>, vector<1x8x16x128xf32>
    %70 = vector.shape_cast %69 : vector<1x8x16x128xf32> to vector<128x128xf32>
    %c896 = arith.constant 896 : index
    %c0_79 = arith.constant 0 : index
    %71 = vector.load %arg3[%c896, %c0_79] : memref<1152x128xf32, #tpu.memory_space<vmem>>, vector<128x128xf32>
    %cst_80 = arith.constant dense<0.000000e+00> : vector<128x128xf32>
    %72 = tpu.matmul %70, %71, %cst_80 {dimension_numbers = #tpu.dot_dimension_numbers<[1], [0], [0], [1], [0, 0, 1, 1], [], []>} : vector<128x128xf32>, vector<128x128xf32>, vector<128x128xf32> -> vector<128x128xf32>
    %73 = arith.addf %68, %72 : vector<128x128xf32>
    %c0_81 = arith.constant 0 : index
    %c2_82 = arith.constant 2 : index
    %c9_83 = arith.constant 9 : index
    %c0_84 = arith.constant 0 : index
    %74 = vector.load %arg6[%c0_81, %c2_82, %c9_83, %c0_84] : memref<1x10x32x128xf32, #tpu.memory_space<vmem>>, vector<1x8x16x128xf32>
    %75 = vector.shape_cast %74 : vector<1x8x16x128xf32> to vector<128x128xf32>
    %c1024 = arith.constant 1024 : index
    %c0_85 = arith.constant 0 : index
    %76 = vector.load %arg3[%c1024, %c0_85] : memref<1152x128xf32, #tpu.memory_space<vmem>>, vector<128x128xf32>
    %cst_86 = arith.constant dense<0.000000e+00> : vector<128x128xf32>
    %77 = tpu.matmul %75, %76, %cst_86 {dimension_numbers = #tpu.dot_dimension_numbers<[1], [0], [0], [1], [0, 0, 1, 1], [], []>} : vector<128x128xf32>, vector<128x128xf32>, vector<128x128xf32> -> vector<128x128xf32>
    %78 = arith.addf %73, %77 : vector<128x128xf32>
    %c0_87 = arith.constant 0 : index
    %c0_88 = arith.constant 0 : index
    %79 = vector.load %arg4[%c0_87, %c0_88] : memref<1x128xf32, #tpu.memory_space<vmem>>, vector<1x128xf32>
    %80 = vector.broadcast %79 : vector<1x128xf32> to vector<128x128xf32>
    %81 = arith.addf %78, %80 : vector<128x128xf32>
    %cst_89 = arith.constant 0.000000e+00 : f32
    %82 = vector.broadcast %cst_89 : f32 to vector<128x128xf32>
    %83 = arith.maximumf %81, %82 : vector<128x128xf32>
    %84 = vector.shape_cast %83 : vector<128x128xf32> to vector<1x8x16x128xf32>
    %c0_90 = arith.constant 0 : index
    %c0_91 = arith.constant 0 : index
    %c0_92 = arith.constant 0 : index
    %c0_93 = arith.constant 0 : index
    %85 = vector.load %arg5[%c0_90, %c0_91, %c0_92, %c0_93] : memref<1x8x16x128xf32, #tpu.memory_space<vmem>>, vector<1x8x16x128xf32>
    tpu.vector_store %arg5[%c0_90, %c0_91, %c0_92, %c0_93], %84 {strides = array<i32>} : memref<1x8x16x128xf32, #tpu.memory_space<vmem>>, vector<1x8x16x128xf32>,
    return
  }
  func.func @transform_1(%arg0: i32, %arg1: i32) -> (i32, i32) {
    %c0_i32 = arith.constant 0 : i32
    %c0_i32_0 = arith.constant 0 : i32
    %c0_i32_1 = arith.constant 0 : i32
    return %c0_i32, %c0_i32_0 : i32, i32
  }
  func.func @transform_2(%arg0: i32, %arg1: i32) -> (i32, i32) {
    %c0_i32 = arith.constant 0 : i32
    %c0_i32_0 = arith.constant 0 : i32
    %c0_i32_1 = arith.constant 0 : i32
    return %c0_i32, %c0_i32_0 : i32, i32
  }
  func.func @transform_3(%arg0: i32, %arg1: i32) -> (i32, i32, i32, i32) {
    %c0_i32 = arith.constant 0 : i32
    %c0_i32_0 = arith.constant 0 : i32
    %c0_i32_1 = arith.constant 0 : i32
    return %arg0, %arg1, %c0_i32, %c0_i32_0 : i32, i32, i32, i32
  }
}

</mosaic_0001>

<bundles_post_ra>
// kernel: tpu_custom_call.1
= control target key start
LH: loop header
LB: loop body
LE: loop exit
PB: predicated region body
PF: predicated region fallthrough
CT: control target
= control target key end

     0   :  { %s2437_s0 = inlined_call_operand.hbm [shape: f32[2,16,16,128], index: 0, kind: input, shape index: {}]   ;;  %s2438_s1 = inlined_call_operand.hbm [shape: f32[1152,128], index: 1, kind: input, shape index: {}]   ;;  %s2439_s2 = inlined_call_operand.vmem [shape: f32[1,128], index: 2, kind: input, shape index: {}]   ;;  %s2440_s3 = inlined_call_operand.hbm [shape: f32[2,16,16,128], index: 3, kind: output, shape index: {}]  }
   0x1   :  { %2446 = sst [smem:[#allocation24_spill]] %s2438_s1 }
   0x2   :  { %8 = vsyncpa [#allocation5], 0 }
   0x3   :  { %9 = vsyncpa [#allocation6], 0 }
   0x4   :  { %11 = vsyncpa [#allocation6 + $0x1], 0  ;;  %s1882_s12 = smov 0   ;;  %s1884_s13 = smov 0  }
   0x5   :  { %s1886_s14 = smov 0   ;;  %s1888_s15 = smov 0  }
   0x6   :  { %s1890_s16 = smov 0   ;;  %s1892_s17 = smov 0  }
   0x7   :  { %s1894_s18 = smov 0   ;;  %s1896_s19 = smov 0  }
   0x8 LB: > { %2447 = sst [smem:[#allocation20_spill]] %s1838_s17  ;;  %s1441_s20 = sadd.s32 4294967295, %s1846_s19   ;;  %s1846_s19 = sphi %s1896_s19, %s17_s19   ;;  %s1842_s18 = sphi %s1894_s18, %s2460_s18   ;;  %s1838_s17 = sphi %s1892_s17, %s2459_s17   ;;  %s1834_s16 = sphi %s1890_s16, %s2458_s16   ;;  %s1830_s15 = sphi %s1888_s15, %s2457_s15   ;;  %s1826_s14 = sphi %s1886_s14, %s2463_s14   ;;  %s1822_s13 = sphi %s1884_s13, %s2462_s13   ;;  %s1818_s12 = sphi %s1882_s12, %s2461_s12  }
   0x9   : > { %2448 = sst [smem:[#allocation21_spill]] %s1842_s18  ;;  %s1442_s21 = sadd.s32 4294967294, %s1846_s19  }
   0xa   : > { %s26_s22 = sadd.s32 1, %s1838_s17  ;;  %s29_s23 = sadd.s32 1, %s1842_s18 }
   0xb   : > { %p27_p0 = scmp.ge.s32.totalorder %s26_s22, 2  ;;  %s80_s24 = sadd.s32 1, %s1826_s14 }
   0xc   : > { %p90_p1 = scmp.ne.s32.totalorder %s1826_s14, %s1822_s13  ;;  %p91_p2 = scmp.eq.s32.totalorder %s1441_s20, 3 }
   0xd   : > { %s2465_s22 = smov (%p27_p0, %s26_s22), 0  ;;  %s2467_s23 = smov (!%p27_p0, %s29_s23), %s1842_s18 }
   0xe   : > { %2449 = sst [smem:[#allocation22_spill]] %s2465_s22  ;;  %s76_s25 = ssub.s32 %s1838_s17, %s2465_s22 }
   0xf   : > { %p1934_p3 = por %p91_p2, %p90_p1  ;;  %p31_p4 = scmp.ge.s32.totalorder %s2467_s23, 2 }
  0x10   : > { %p96_p5 = scmp.ne.s32.totalorder %s1822_s13, %s1818_s12  ;;  %p97_p6 = scmp.eq.s32.totalorder %s1442_s21, 3 }
  0x11   : > { %p1443_p7 = scmp.ge.s32.totalorder %s1846_s19, 1  ;;  %s2469_s23 = smov (%p31_p4, %s2467_s23), 0 }
  0x12   : > { %2451 = sst [smem:[#allocation23_spill]] %s2469_s23  ;;  %p1943_p8 = por %p97_p6, %p96_p5 }
  0x13   : > { %p104_p9 = scmp.lt.s32.totalorder %s1846_s19, 5  ;;  %s75_s28 = ssub.s32 %s1842_s18, %s2469_s23 }
  0x14   : > { %s77_s29 = sor.u32 %s76_s25, %s75_s28  ;;  %p1954_p12 = scmp.eq.s32.totalorder %s1441_s20, 0 }
  0x15   : > { %p1950_p10 = pnand %p1443_p7, %p104_p9  ;;  %p78_p11 = scmp.eq.s32.totalorder %s77_s29, 0 }
  0x16   : > { %s2455_s1 = sld [smem:[#allocation24_spill]]  ;;  %s1848_s9 = smov [#allocation4]  }
  0x17   : > { %p1534_p13 = pneg %p1950_p10  ;;  %s117_s10 = sshll.u32 %s1848_s9, 4  ;;  %s118_s10 = int_to_ptr.vmem [resolvable:$true] %s117_s10 }
  0x18   : > { %s1964_s8 = scalar_select %p78_p11, %s1826_s14, %s80_s24  }
  0x19   : > { %p1535_p0 = pnand %p1954_p12, %p1534_p13  ;;  %s1849_s11 = smov 128  }
  0x1a   : > { %s1850_s20 = smov 8   ;;  %136 = sbr.rel (%p1950_p10) target bundleno = 587 (0x24b), region = 28 }
  0x1c   : > { %s115_s7 = sshll.u32 %s2455_s1, 4  ;;  %s116_s7 = int_to_ptr.hbm [resolvable:$true] %s115_s7 }
  0x1d   : > { %1537 = dma.hbm_to_vmem [thread:$0]  (!%p1535_p0), %s116_s7, 18432, %s118_s10, [#allocation5], %s1849_s11, %s1849_s11, %s1850_s20  }
  0x1f   : > { %1799 = dma.done.wait (%p1954_p12), [#allocation5], 18432  }
  0x20   : > { %1801 = vsyncadd (%p1954_p12), [#allocation5], 4294948864  ;;  %s2441_s21 = sand.u32 1, %s1822_s13   ;;  %s1470_s24 = sshll.u32 %s1830_s15, 7 }
  0x21   : > { %s1978_s25 = sshll.u32 %s2441_s21, 7  ;;  %s1981_s28 = sshll.u32 %s1834_s16, 8 }
  0x22   : > { %s164_s29 = sadd.s32 %s1470_s24, %s1981_s28  ;;  %s1851_s7 = smov [#allocation2 + $0x28]  }
  0x23   : > { %s165_s6 = scalar_lea.hbm %s2437_s0, %s164_s29  ;;  %s169_s9 = sshll.u32 %s1851_s7, 4  ;;  %s170_s9 = int_to_ptr.vmem [resolvable:$true] %s169_s9 }
  0x24   : > { %s167_s4 = sshll.u32 %s165_s6, 4  ;;  %s1448_s10 = sshll.u32 %s1830_s15, 3  ;;  %s168_s4 = int_to_ptr.hbm [resolvable:$true] %s167_s4 }
  0x25   : > { %s1658_s11 = sshra.s32 %s168_s4, 4  ;;  %s1991_s23 = scalar_lea.hbm %s2437_s0, 512  ;;  %s1659_s11 = int_to_ptr.hbm [resolvable:$true] %s1658_s11 }
  0x26   : > { %s1660_s20 = scalar_lea.hbm %s1659_s11, 128  ;;  %p1663_p2 = scmp.lt.s32.totalorder %s1659_s11, %s2437_s0 }
  0x27   : > { %p1661_p1 = scmp.ne.s32.totalorder %s1659_s11, %s1660_s20  ;;  %p1664_p4 = scmp.lt.s32.totalorder %s1991_s23, %s1660_s20 }
  0x29   : > { %p1665_p5 = por %p1664_p4, %p1663_p2 }
  0x2b   : > { %p1666_p6 = pnand %p1665_p5, %p1661_p1 }
  0x2d   : > { %1669 = shalt.err (!%p1666_p6)  }
  0x2e   : > { %s1852_s29 = smov 256   ;;  %s1853_s30 = smov 512  }
  0x2f   : > { %s1854_s5 = smov 16   ;;  %s1449_s6 = sadd.s32 4294967295, %s1448_s10 }
  0x30   : > { %174 = dma.hbm_to_vmem [thread:$0]  %s168_s4, 2048, %s170_s9, [#allocation3], %s1852_s29, %s1853_s30, %s1854_s5 }
  0x31   : > { %p157_p7 = scmp.gt.s32.totalorder %s1449_s6, 0  ;;  %s159_s1 = sadd.s32 8, %s1448_s10 }
  0x32   : > { %p1544_p9 = scmp.gt.s32.totalorder %s1830_s15, 0  ;;  %s1855_s21 = smov [#allocation2 + $0x8]  }
  0x33   : > { %s2471_s6 = smov (!%p157_p7, %s1449_s6), 0  ;;  %s193_s22 = sshll.u32 %s1855_s21, 4  ;;  %s194_s22 = int_to_ptr.vmem [resolvable:$true] %s193_s22 }
  0x34   : > { %s1453_s7 = sshll.u32 %s2471_s6, 4  ;;  %p160_p10 = scmp.lt.s32.totalorder %s159_s1, 15 }
  0x35   : > { %s180_s11 = sadd.s32 %s1453_s7, %s1981_s28 }
  0x36   : > { %s181_s18 = scalar_lea.hbm %s2437_s0, %s180_s11 }
  0x37   : > { %s191_s17 = sshll.u32 %s181_s18, 4  ;;  %s192_s17 = int_to_ptr.hbm [resolvable:$true] %s191_s17 }
  0x38   : > { %s1682_s4 = sshra.s32 %s192_s17, 4  ;;  %s1683_s4 = int_to_ptr.hbm [resolvable:$true] %s1682_s4 }
  0x39   : > { %s1684_s9 = scalar_lea.hbm %s1683_s4, 16  ;;  %p1689_p0 = scmp.lt.s32.totalorder %s1683_s4, %s2437_s0 }
  0x3a   : > { %p1685_p11 = scmp.ne.s32.totalorder %s1683_s4, %s1684_s9  ;;  %p1690_p1 = scmp.lt.s32.totalorder %s1991_s23, %s1684_s9 }
  0x3c   : > { %p1686_p12 = pnand %p1685_p11, %p1544_p9  ;;  %p1691_p2 = por %p1690_p1, %p1689_p0 }
  0x3e   : > { %p1687_p13 = pneg %p1686_p12 }
  0x40   : > { %p1692_p4 = pnand %p1691_p2, %p1687_p13 }
  0x42   : > { %1695 = shalt.err (!%p1692_p4)  }
  0x43   : > { %1525 = dma.hbm_to_vmem [thread:$0]  (%p1544_p9), %s192_s17, 256, %s194_s22, [#allocation3 + $0x1] }
  0x44   : > { %s2473_s1 = smov (!%p160_p10, %s159_s1), 15  ;;  %s1856_s18 = smov [#allocation2 + $0x128]  }
  0x45   : > { %s215_s30 = sshll.u32 %s1856_s18, 4  ;;  %s1455_s5 = sshll.u32 %s2473_s1, 4  ;;  %s216_s30 = int_to_ptr.vmem [resolvable:$true] %s215_s30 }
  0x46   : > { %p1545_p5 = scmp.lt.s32.totalorder %s1830_s15, 1  ;;  %s202_s6 = sadd.s32 %s1455_s5, %s1981_s28 }
  0x47   : > { %s203_s11 = scalar_lea.hbm %s2437_s0, %s202_s6 }
  0x48   : > { %s213_s20 = sshll.u32 %s203_s11, 4  ;;  %s214_s20 = int_to_ptr.hbm [resolvable:$true] %s213_s20 }
  0x49   : > { %s1710_s24 = sshra.s32 %s214_s20, 4  ;;  %s1711_s24 = int_to_ptr.hbm [resolvable:$true] %s1710_s24 }
  0x4a   : > { %s1712_s4 = scalar_lea.hbm %s1711_s24, 16  ;;  %p1717_p11 = scmp.lt.s32.totalorder %s1711_s24, %s2437_s0 }
  0x4b   : > { %p1713_p6 = scmp.ne.s32.totalorder %s1711_s24, %s1712_s4  ;;  %p1718_p12 = scmp.lt.s32.totalorder %s1991_s23, %s1712_s4 }
  0x4d   : > { %p1714_p7 = pnand %p1713_p6, %p1545_p5  ;;  %p1719_p13 = por %p1718_p12, %p1717_p11 }
  0x4f   : > { %p1715_p10 = pneg %p1714_p7 }
  0x51   : > { %p1720_p0 = pnand %p1719_p13, %p1715_p10 }
  0x53   : > { %1723 = shalt.err (!%p1720_p0)  }
  0x54   : > { %1527 = dma.hbm_to_vmem [thread:$0]  (%p1545_p5), %s214_s20, 256, %s216_s30, [#allocation3 + $0x2]  ;;  %v1857_v0 = vmov 0.0  }
  0x55   : > { %219 = vst [vmem:[#allocation2] sm:$0xff] %v1857_v0  ;;  %s2025_s23 = scalar_lea.vmem [#allocation7], %s1978_s25  ;;  %p1456_p1 = scmp.ne.s32.totalorder %s1830_s15, 0 }
  0x56   : > { %220 = vst [vmem:[#allocation2 + $0x20] sm:$0xff] %v1857_v0 }
  0x57   : > { %221 = vst [vmem:[#allocation2 + $0x40] sm:$0xff] %v1857_v0 }
  0x58   : > { %222 = vst [vmem:[#allocation2 + $0x60] sm:$0xff] %v1857_v0 }
  0x59   : > { %223 = vst [vmem:[#allocation2 + $0x80] sm:$0xff] %v1857_v0 }
  0x5a   : > { %224 = vst [vmem:[#allocation2 + $0xa0] sm:$0xff] %v1857_v0 }
  0x5b   : > { %225 = vst [vmem:[#allocation2 + $0xc0] sm:$0xff] %v1857_v0 }
  0x5c   : > { %226 = vst [vmem:[#allocation2 + $0xe0] sm:$0xff] %v1857_v0 }
  0x5d   : > { %227 = vst [vmem:[#allocation2 + $0x100] sm:$0xff] %v1857_v0 }
  0x5e   : > { %228 = vst [vmem:[#allocation2 + $0x120] sm:$0xff] %v1857_v0 }
  0x5f   : > { %229 = vst [vmem:[#allocation2 + $0x18] sm:$0xff] %v1857_v0 }
  0x60   : > { %230 = vst [vmem:[#allocation2 + $0x38] sm:$0xff] %v1857_v0 }
  0x61   : > { %231 = vst [vmem:[#allocation2 + $0x58] sm:$0xff] %v1857_v0 }
  0x62   : > { %232 = vst [vmem:[#allocation2 + $0x78] sm:$0xff] %v1857_v0 }
  0x63   : > { %233 = vst [vmem:[#allocation2 + $0x98] sm:$0xff] %v1857_v0 }
  0x64   : > { %234 = vst [vmem:[#allocation2 + $0xb8] sm:$0xff] %v1857_v0  ;;  %242 = sbr.rel (%p1456_p1) target bundleno = 108 (0x6c), region = 52 }
  0x65   : > { %235 = vst [vmem:[#allocation2 + $0xd8] sm:$0xff] %v1857_v0 }
  0x66   : > { %236 = vst [vmem:[#allocation2 + $0xf8] sm:$0xff] %v1857_v0 }
  0x67   : > { %237 = vst [vmem:[#allocation2 + $0x118] sm:$0xff] %v1857_v0 }
  0x68   : > { %238 = vst [vmem:[#allocation2 + $0x138] sm:$0xff] %v1857_v0 }
  0x69   : > { %v1858_v1 = vmov 0.0  }
  0x6a   : > { %243 = vst [vmem:[#allocation2 + $0x8] sm:$0xff] %v1858_v1 }
  0x6b   : > { %244 = vst [vmem:[#allocation2 + $0x10] sm:$0xff] %v1858_v1 }
  0x6c PF: > { %p1457_p2 = scmp.ne.s32.totalorder %s1830_s15, 1 }
  0x6e   : > { %248 = sbr.rel (%p1457_p2) target bundleno = 118 (0x76), region = 56 }
  0x73   : > { %v1859_v2 = vmov 0.0  }
  0x74   : > { %250 = vst [vmem:[#allocation2 + $0x128] sm:$0xff] %v1859_v2 }
  0x75   : > { %251 = vst [vmem:[#allocation2 + $0x130] sm:$0xff] %v1859_v2 }
  0x76 PF: > { %1802 = dma.done.wait [#allocation3], 2048 }
  0x77   : > { %1803 = vsyncadd [#allocation3], 4294965248 }
  0x78   : > { %1805 = dma.done.wait (%p1544_p9), [#allocation3 + $0x1], 256 }
  0x79   : > { %1807 = vsyncadd (%p1544_p9), [#allocation3 + $0x1], 4294967040 }
  0x7a   : > { %1809 = dma.done.wait (%p1545_p5), [#allocation3 + $0x2], 256 }
  0x7b   : > { %1811 = vsyncadd (%p1545_p5), [#allocation3 + $0x2], 4294967040  ;;  %v338_v3 = vld [vmem:[#allocation4 + $0xf8] sm:$0xff]  ;;  %v337_v4 = vld [vmem:[#allocation4 + $0xf0] sm:$0xff]  ;;  %s1471_s1 = sshll.u32 %s1830_s15, 4  ;;  %s1463_s9 = sshll.u32 %s1834_s16, 5 }
  0x7c   : > { %1472 = vmatpush.msra.mxu1 %v338_v3  ;;  %1473 = vmatpush.msra.mxu2 %v338_v3  ;;  %v336_v5 = vld [vmem:[#allocation4 + $0xe8] sm:$0xff]  ;;  %v335_v6 = vld [vmem:[#allocation4 + $0xe0] sm:$0xff]  ;;  %v334_v7 = vld [vmem:[#allocation4 + $0xd8] sm:$0xff]  ;;  %s1327_s10 = sadd.s32 %s1471_s1, %s1463_s9  ;;  %s1330_s30 = sshll.u32 %s2025_s23, 4  ;;  %s1331_s30 = int_to_ptr.vmem [resolvable:$true] %s1330_s30 }
  0x7d   : > { %1474 = vmatpush.msra.mxu3 %v338_v3  ;;  %339 = vmatpush.msra.mxu0 %v338_v3  ;;  %v333_v8 = vld [vmem:[#allocation4 + $0xd0] sm:$0xff]  ;;  %v332_v9 = vld [vmem:[#allocation4 + $0xc8] sm:$0xff]  ;;  %v331_v10 = vld [vmem:[#allocation4 + $0xc0] sm:$0xff]  ;;  %s1464_s29 = sshll.u32 %s1327_s10, 3  ;;  %s2456_s6 = sand.u32 1, %s1822_s13  }
  0x7e   : > { %1475 = vmatpush.msra.mxu1 %v337_v4  ;;  %1476 = vmatpush.msra.mxu2 %v337_v4  ;;  %v330_v11 = vld [vmem:[#allocation4 + $0xb8] sm:$0xff]  ;;  %v329_v12 = vld [vmem:[#allocation4 + $0xb0] sm:$0xff]  ;;  %v328_v13 = vld [vmem:[#allocation4 + $0xa8] sm:$0xff]  ;;  %s1329_s18 = scalar_lea.hbm %s2440_s3, %s1464_s29  ;;  %s1315_s21 = scalar_lea.sflag [#allocation6], %s2456_s6 }
  0x7f   : > { %1477 = vmatpush.msra.mxu3 %v337_v4  ;;  %340 = vmatpush.msra.mxu0 %v337_v4  ;;  %v327_v14 = vld [vmem:[#allocation4 + $0xa0] sm:$0xff]  ;;  %v326_v15 = vld [vmem:[#allocation4 + $0x98] sm:$0xff]  ;;  %v325_v16 = vld [vmem:[#allocation4 + $0x90] sm:$0xff]  ;;  %s1332_s5 = sshll.u32 %s1329_s18, 4  ;;  %s1758_s4 = scalar_lea.hbm %s2440_s3, 512  ;;  %s1333_s5 = int_to_ptr.hbm [resolvable:$true] %s1332_s5 }
  0x80   : > { %1478 = vmatpush.msra.mxu1 %v336_v5  ;;  %1479 = vmatpush.msra.mxu2 %v336_v5  ;;  %v324_v17 = vld [vmem:[#allocation4 + $0x88] sm:$0xff]  ;;  %v323_v18 = vld [vmem:[#allocation4 + $0x80] sm:$0xff]  ;;  %v500_v21 = vld [vmem:[#allocation4 + $0x178] sm:$0xff]  ;;  %s1752_s7 = sshra.s32 %s1333_s5, 4  ;;  %s1753_s7 = int_to_ptr.hbm [resolvable:$true] %s1752_s7 }
  0x81   : > { %1480 = vmatpush.msra.mxu3 %v336_v5  ;;  %341 = vmatpush.msra.mxu0 %v336_v5  ;;  %v2037_v19 = vld [vmem:[#allocation2 + $0x48] sm:$0xff]  ;;  %v306_v22 = vld [vmem:[#allocation4 + $0x78] sm:$0xff]  ;;  %v499_v24 = vld [vmem:[#allocation4 + $0x170] sm:$0xff]  ;;  %s1754_s11 = scalar_lea.hbm %s1753_s7, 128  ;;  %p1759_p6 = scmp.lt.s32.totalorder %s1753_s7, %s2440_s3 }
  0x82   : > { %1481 = vmatpush.msra.mxu1 %v335_v6  ;;  %1482 = vmatpush.msra.mxu2 %v335_v6  ;;  %v2039_v20 = vld [vmem:[#allocation2 + $0x88] sm:$0xff]  ;;  %v614_v25 = vld [vmem:[#allocation4 + $0x1f8] sm:$0xff]  ;;  %v305_v26 = vld [vmem:[#allocation4 + $0x70] sm:$0xff]  ;;  %p1755_p9 = scmp.ne.s32.totalorder %s1753_s7, %s1754_s11  ;;  %p1760_p7 = scmp.lt.s32.totalorder %s1758_s4, %s1754_s11 }
  0x83   : > { %1483 = vmatpush.msra.mxu3 %v335_v6  ;;  %342 = vmatpush.msra.mxu0 %v335_v6  ;;  %v2041_v23 = vld [vmem:[#allocation2 + $0xc8] sm:$0xff]  ;;  %v613_v28 = vld [vmem:[#allocation4 + $0x1f0] sm:$0xff]  ;;  %v497_v31 = vld [vmem:[#allocation4 + $0x160] sm:$0xff] }
  0x84   : > { %1484 = vmatpush.msra.mxu1 %v334_v7  ;;  %1485 = vmatpush.msra.mxu2 %v334_v7  ;;  %v498_v27 = vld [vmem:[#allocation4 + $0x168] sm:$0xff]  ;;  %v303_v33 = vld [vmem:[#allocation4 + $0x60] sm:$0xff]  ;;  %v2046_v34 = vld [vmem:[#allocation2 + $0x90] sm:$0xff]  ;;  %p1756_p4 = pnand %p1755_p9, %p1934_p3  ;;  %p1761_p10 = por %p1760_p7, %p1759_p6 }
  0x85   : > { %1486 = vmatpush.msra.mxu3 %v334_v7  ;;  %343 = vmatpush.msra.mxu0 %v334_v7  ;;  %v304_v29 = vld [vmem:[#allocation4 + $0x68] sm:$0xff]  ;;  %v2048_v35 = vld [vmem:[#allocation2 + $0x50] sm:$0xff]  ;;  %v496_v36 = vld [vmem:[#allocation4 + $0x158] sm:$0xff] }
  0x86   : > { %1487 = vmatpush.msra.mxu1 %v333_v8  ;;  %1488 = vmatpush.msra.mxu2 %v333_v8  ;;  %v307_v30 = vld [vmem:[#allocation2 + $0x8] sm:$0xff]  ;;  %v611_v37 = vld [vmem:[#allocation4 + $0x1e0] sm:$0xff]  ;;  %v302_v38 = vld [vmem:[#allocation4 + $0x58] sm:$0xff]  ;;  %p1757_p5 = pneg %p1756_p4 }
  0x87   : > { %1489 = vmatpush.msra.mxu3 %v333_v8  ;;  %344 = vmatpush.msra.mxu0 %v333_v8  ;;  %v612_v32 = vld [vmem:[#allocation4 + $0x1e8] sm:$0xff]  ;;  %v2051_v39 = vld [vmem:[#allocation2 + $0xd0] sm:$0xff]  ;;  %v610_v41 = vld [vmem:[#allocation4 + $0x1d8] sm:$0xff] }
  0x88   : > { %1490 = vmatpush.msra.mxu1 %v332_v9  ;;  %1491 = vmatpush.msra.mxu2 %v332_v9  ;;  %v495_v40 = vld [vmem:[#allocation4 + $0x150] sm:$0xff]  ;;  %v727_v42 = vld [vmem:[#allocation4 + $0x278] sm:$0xff]  ;;  %v494_v44 = vld [vmem:[#allocation4 + $0x148] sm:$0xff]  ;;  %p1762_p11 = pnand %p1761_p10, %p1757_p5 }
  0x89   : > { %1492 = vmatpush.msra.mxu3 %v332_v9  ;;  %345 = vmatpush.msra.mxu0 %v332_v9  ;;  %v301_v43 = vld [vmem:[#allocation4 + $0x50] sm:$0xff]  ;;  %v300_v47 = vld [vmem:[#allocation4 + $0x48] sm:$0xff]  ;;  %v493_v48 = vld [vmem:[#allocation4 + $0x140] sm:$0xff] }
  0x8a   : > { %1493 = vmatpush.msra.mxu1 %v331_v10  ;;  %1494 = vmatpush.msra.mxu2 %v331_v10  ;;  %v609_v45 = vld [vmem:[#allocation4 + $0x1d0] sm:$0xff]  ;;  %v608_v49 = vld [vmem:[#allocation4 + $0x1c8] sm:$0xff]  ;;  %v299_v51 = vld [vmem:[#allocation4 + $0x40] sm:$0xff] }
  0x8b   : > { %1495 = vmatpush.msra.mxu3 %v331_v10  ;;  %346 = vmatpush.msra.mxu0 %v331_v10  ;;  %v726_v46 = vld [vmem:[#allocation4 + $0x270] sm:$0xff]  ;;  %v725_v50 = vld [vmem:[#allocation4 + $0x268] sm:$0xff]  ;;  %v492_v54 = vld [vmem:[#allocation4 + $0x138] sm:$0xff] }
  0x8c   : > { %1496 = vmatpush.msra.mxu1 %v330_v11  ;;  %1497 = vmatpush.msra.mxu2 %v330_v11  ;;  %v2055_v52 = vld [vmem:[#allocation2 + $0xa8] sm:$0xff]  ;;  %v607_v55 = vld [vmem:[#allocation4 + $0x1c0] sm:$0xff]  ;;  %v298_v57 = vld [vmem:[#allocation4 + $0x38] sm:$0xff] }
  0x8d   : > { %1498 = vmatpush.msra.mxu3 %v330_v11  ;;  %347 = vmatpush.msra.mxu0 %v330_v11  ;;  %v2057_v53 = vld [vmem:[#allocation2 + $0x68] sm:$0xff]  ;;  %v724_v56 = vld [vmem:[#allocation4 + $0x260] sm:$0xff]  ;;  %v308_v58 = vld [vmem:[#allocation2 + $0x10] sm:$0xff] }
  0x8e   : > { %1499 = vmatpush.msra.mxu1 %v329_v12  ;;  %1500 = vmatpush.msra.mxu2 %v329_v12  ;;  %v2061_v59 = vld [vmem:[#allocation2 + $0xe8] sm:$0xff]  ;;  %v491_v60 = vld [vmem:[#allocation4 + $0x130] sm:$0xff]  ;;  %v606_v61 = vld [vmem:[#allocation4 + $0x1b8] sm:$0xff] }
  0x8f   : > { %1501 = vmatpush.msra.mxu3 %v329_v12  ;;  %348 = vmatpush.msra.mxu0 %v329_v12  ;;  %v723_v62 = vld [vmem:[#allocation4 + $0x258] sm:$0xff]  ;;  %v297_v63 = vld [vmem:[#allocation4 + $0x30] sm:$0xff]  ;;  %v490_v0 = vld [vmem:[#allocation4 + $0x128] sm:$0xff] }
  0x90   : > { %1502 = vmatpush.msra.mxu1 %v328_v13  ;;  %1503 = vmatpush.msra.mxu2 %v328_v13  ;;  %v605_v1 = vld [vmem:[#allocation4 + $0x1b0] sm:$0xff]  ;;  %v296_v3 = vld [vmem:[#allocation4 + $0x28] sm:$0xff]  ;;  %v489_v4 = vld [vmem:[#allocation4 + $0x120] sm:$0xff] }
  0x91   : > { %1504 = vmatpush.msra.mxu3 %v328_v13  ;;  %349 = vmatpush.msra.mxu0 %v328_v13  ;;  %v722_v2 = vld [vmem:[#allocation4 + $0x250] sm:$0xff]  ;;  %v604_v5 = vld [vmem:[#allocation4 + $0x1a8] sm:$0xff]  ;;  %v295_v7 = vld [vmem:[#allocation4 + $0x20] sm:$0xff] }
  0x92   : > { %1505 = vmatpush.msra.mxu1 %v327_v14  ;;  %1506 = vmatpush.msra.mxu2 %v327_v14  ;;  %v721_v6 = vld [vmem:[#allocation4 + $0x248] sm:$0xff]  ;;  %v2064_v8 = vld [vmem:[#allocation2 + $0xb0] sm:$0xff]  ;;  %v488_v10 = vld [vmem:[#allocation4 + $0x118] sm:$0xff] }
  0x93   : > { %1507 = vmatpush.msra.mxu3 %v327_v14  ;;  %350 = vmatpush.msra.mxu0 %v327_v14  ;;  %v2066_v9 = vld [vmem:[#allocation2 + $0x70] sm:$0xff]  ;;  %v603_v11 = vld [vmem:[#allocation4 + $0x1a0] sm:$0xff]  ;;  %v294_v13 = vld [vmem:[#allocation4 + $0x18] sm:$0xff] }
  0x94   : > { %1508 = vmatpush.msra.mxu1 %v326_v15  ;;  %1509 = vmatpush.msra.mxu2 %v326_v15  ;;  %v720_v12 = vld [vmem:[#allocation4 + $0x240] sm:$0xff]  ;;  %v2069_v14 = vld [vmem:[#allocation2 + $0x28] sm:$0xff] }
  0x95   : > { %1510 = vmatpush.msra.mxu3 %v326_v15  ;;  %351 = vmatpush.msra.mxu0 %v326_v15  ;;  %v2072_v15 = vld [vmem:[#allocation2 + $0xf0] sm:$0xff] }
  0x96   : > { %1511 = vmatpush.msra.mxu1 %v325_v16  ;;  %1512 = vmatpush.msra.mxu2 %v325_v16 }
  0x97   : > { %1513 = vmatpush.msra.mxu3 %v325_v16  ;;  %352 = vmatpush.msra.mxu0 %v325_v16  ;;  %v487_v16 = vld [vmem:[#allocation4 + $0x110] sm:$0xff] }
  0x98   : > { %1514 = vmatpush.msra.mxu1 %v324_v17  ;;  %1515 = vmatpush.msra.mxu2 %v324_v17 }
  0x99   : > { %1516 = vmatpush.msra.mxu3 %v324_v17  ;;  %353 = vmatpush.msra.mxu0 %v324_v17  ;;  %v602_v17 = vld [vmem:[#allocation4 + $0x198] sm:$0xff] }
  0x9a   : > { %1517 = vmatpush.msra.mxu1 %v323_v18  ;;  %1518 = vmatpush.msra.mxu2 %v323_v18 }
  0x9b   : > { %367 = vmatmul.f32.vlgmr.msra.gmra.mxu1 %v2037_v19  ;;  %379 = vmatmul.f32.vlgmr.msra.gmra.mxu2 %v2039_v20 }
  0x9c   : > { %501 = vmatpush.msrb.mxu2 %v500_v21  ;;  %1519 = vmatpush.msra.mxu3 %v323_v18  ;;  %v293_v21 = vld [vmem:[#allocation4 + $0x10] sm:$0xff] }
  0x9d   : > { %404 = vmatpush.msrb.mxu1 %v306_v22  ;;  %391 = vmatmul.f32.vlgmr.msra.gmra.mxu3 %v2041_v23  ;;  %v486_v22 = vld [vmem:[#allocation4 + $0x108] sm:$0xff] }
  0x9e   : > { %502 = vmatpush.msrb.mxu2 %v499_v24  ;;  %615 = vmatpush.msrb.mxu3 %v614_v25  ;;  %v601_v24 = vld [vmem:[#allocation4 + $0x190] sm:$0xff] }
  0x9f   : > { %405 = vmatpush.msrb.mxu1 %v305_v26  ;;  %354 = vmatpush.msra.mxu0 %v323_v18  ;;  %v719_v18 = vld [vmem:[#allocation4 + $0x238] sm:$0xff]  ;;  %v718_v25 = vld [vmem:[#allocation4 + $0x230] sm:$0xff]  ;;  %v292_v26 = vld [vmem:[#allocation4 + $0x8] sm:$0xff] }
  0xa0   : > { %503 = vmatpush.msrb.mxu2 %v498_v27  ;;  %616 = vmatpush.msrb.mxu3 %v613_v28  ;;  %v485_v27 = vld [vmem:[#allocation4 + $0x100] sm:$0xff]  ;;  %v600_v28 = vld [vmem:[#allocation4 + $0x188] sm:$0xff] }
  0xa1   : > { %406 = vmatpush.msrb.mxu1 %v304_v29  ;;  %355 = vmatmul.f32.vlgmr.msra.gmra.mxu0 %v307_v30  ;;  %v717_v29 = vld [vmem:[#allocation4 + $0x228] sm:$0xff]  ;;  %v291_v30 = vld [vmem:[#allocation4] sm:$0xff] }
  0xa2   : > { %504 = vmatpush.msrb.mxu2 %v497_v31  ;;  %617 = vmatpush.msrb.mxu3 %v612_v32  ;;  %v469_v31 = vld [vmem:[#allocation2 + $0x9] sm:$0xff] }
  0xa3   : > { %407 = vmatpush.msrb.mxu1 %v303_v33  ;;  %382 = vmatmul.f32.gmra.mxu2 %v2046_v34  ;;  %v275_v32 = vld [vmem:[#allocation2 + $0x7] sm:$0xff] }
  0xa4   : > { %370 = vmatmul.f32.gmra.mxu1 %v2048_v35  ;;  %505 = vmatpush.msrb.mxu2 %v496_v36  ;;  %v599_v33 = vld [vmem:[#allocation4 + $0x180] sm:$0xff] }
  0xa5   : > { %618 = vmatpush.msrb.mxu3 %v611_v37  ;;  %408 = vmatpush.msrb.mxu1 %v302_v38  ;;  %v716_v36 = vld [vmem:[#allocation4 + $0x220] sm:$0xff]  ;;  %v954_v37 = vld [vmem:[#allocation4 + $0x378] sm:$0xff]  ;;  %v2076_v38 = vld [vmem:[#allocation2 + $0x30] sm:$0xff] }
  0xa6   : > { %394 = vmatmul.f32.gmra.mxu3 %v2051_v39  ;;  %506 = vmatpush.msrb.mxu2 %v495_v40  ;;  %v583_v40 = vld [vmem:[#allocation2 + $0x27] sm:$0xff] }
  0xa7   : > { %619 = vmatpush.msrb.mxu3 %v610_v41  ;;  %728 = vmatpush.msrb.mxu0 %v727_v42  ;;  %v715_v41 = vld [vmem:[#allocation4 + $0x218] sm:$0xff] }
  0xa8   : > { %409 = vmatpush.msrb.mxu1 %v301_v43  ;;  %507 = vmatpush.msrb.mxu2 %v494_v44  ;;  %v1067_v42 = vld [vmem:[#allocation4 + $0x3f8] sm:$0xff]  ;;  %v953_v44 = vld [vmem:[#allocation4 + $0x370] sm:$0xff] }
  0xa9   : > { %620 = vmatpush.msrb.mxu3 %v609_v45  ;;  %729 = vmatpush.msrb.mxu0 %v726_v46  ;;  %v840_v43 = vld [vmem:[#allocation4 + $0x2f8] sm:$0xff]  ;;  %v714_v45 = vld [vmem:[#allocation4 + $0x210] sm:$0xff] }
  0xaa   : > { %410 = vmatpush.msrb.mxu1 %v300_v47  ;;  %508 = vmatpush.msrb.mxu2 %v493_v48  ;;  %v1066_v46 = vld [vmem:[#allocation4 + $0x3f0] sm:$0xff]  ;;  %v952_v48 = vld [vmem:[#allocation4 + $0x368] sm:$0xff] }
  0xab   : > { %621 = vmatpush.msrb.mxu3 %v608_v49  ;;  %730 = vmatpush.msrb.mxu0 %v725_v50  ;;  %v839_v47 = vld [vmem:[#allocation4 + $0x2f0] sm:$0xff]  ;;  %v713_v49 = vld [vmem:[#allocation4 + $0x208] sm:$0xff] }
  0xac   : > { %411 = vmatpush.msrb.mxu1 %v299_v51  ;;  %385 = vmatmul.f32.gmra.mxu2 %v2055_v52  ;;  %v470_v50 = vld [vmem:[#allocation2 + $0x11] sm:$0xff] }
  0xad   : > { %373 = vmatmul.f32.gmra.mxu1 %v2057_v53  ;;  %509 = vmatpush.msrb.mxu2 %v492_v54  ;;  %v276_v51 = vld [vmem:[#allocation2 + $0xf] sm:$0xff] }
  0xae   : > { %622 = vmatpush.msrb.mxu3 %v607_v55  ;;  %731 = vmatpush.msrb.mxu0 %v724_v56  ;;  %v1065_v54 = vld [vmem:[#allocation4 + $0x3e8] sm:$0xff]  ;;  %v712_v55 = vld [vmem:[#allocation4 + $0x200] sm:$0xff] }
  0xaf   : > { %412 = vmatpush.msrb.mxu1 %v298_v57  ;;  %358 = vmatmul.f32.gmra.mxu0 %v308_v58  ;;  %v838_v56 = vld [vmem:[#allocation4 + $0x2e8] sm:$0xff]  ;;  %v1180_v58 = vld [vmem:[#allocation4 + $0x478] sm:$0xff] }
  0xb0   : > { %397 = vmatmul.f32.gmra.mxu3 %v2061_v59  ;;  %510 = vmatpush.msrb.mxu2 %v491_v60  ;;  %v584_v57 = vld [vmem:[#allocation2 + $0x2f] sm:$0xff]  ;;  %v951_v60 = vld [vmem:[#allocation4 + $0x360] sm:$0xff] }
  0xb1   : > { %623 = vmatpush.msrb.mxu3 %v606_v61  ;;  %732 = vmatpush.msrb.mxu0 %v723_v62  ;;  %v1064_v61 = vld [vmem:[#allocation4 + $0x3e0] sm:$0xff] }
  0xb2   : > { %413 = vmatpush.msrb.mxu1 %v297_v63  ;;  %511 = vmatpush.msrb.mxu2 %v490_v0  ;;  %v837_v62 = vld [vmem:[#allocation4 + $0x2e0] sm:$0xff]  ;;  %v1179_v63 = vld [vmem:[#allocation4 + $0x470] sm:$0xff]  ;;  %v950_v0 = vld [vmem:[#allocation4 + $0x358] sm:$0xff] }
  0xb3   : > { %624 = vmatpush.msrb.mxu3 %v605_v1  ;;  %733 = vmatpush.msrb.mxu0 %v722_v2  ;;  %v1063_v1 = vld [vmem:[#allocation4 + $0x3d8] sm:$0xff] }
  0xb4   : > { %414 = vmatpush.msrb.mxu1 %v296_v3  ;;  %512 = vmatpush.msrb.mxu2 %v489_v4  ;;  %v836_v2 = vld [vmem:[#allocation4 + $0x2d8] sm:$0xff]  ;;  %v2080_v3 = vld [vmem:[#allocation2 + $0x29] sm:$0xff] }
  0xb5   : > { %625 = vmatpush.msrb.mxu3 %v604_v5  ;;  %734 = vmatpush.msrb.mxu0 %v721_v6  ;;  %v1178_v4 = vld [vmem:[#allocation4 + $0x468] sm:$0xff]  ;;  %v949_v5 = vld [vmem:[#allocation4 + $0x350] sm:$0xff]  ;;  %v1177_v6 = vld [vmem:[#allocation4 + $0x460] sm:$0xff] }
  0xb6   : > { %415 = vmatpush.msrb.mxu1 %v295_v7  ;;  %388 = vmatmul.f32.gmra.mxu2 %v2064_v8  ;;  %v1062_v7 = vld [vmem:[#allocation4 + $0x3d0] sm:$0xff] }
  0xb7   : > { %376 = vmatmul.f32.gmra.mxu1 %v2066_v9  ;;  %513 = vmatpush.msrb.mxu2 %v488_v10  ;;  %v2083_v10 = vld [vmem:[#allocation2 + $0x47] sm:$0xff] }
  0xb8   : > { %626 = vmatpush.msrb.mxu3 %v603_v11  ;;  %735 = vmatpush.msrb.mxu0 %v720_v12  ;;  %v1176_v11 = vld [vmem:[#allocation4 + $0x458] sm:$0xff]  ;;  %v835_v12 = vld [vmem:[#allocation4 + $0x2d0] sm:$0xff] }
  0xb9   : > { %416 = vmatpush.msrb.mxu1 %v294_v13  ;;  %361 = vmatmul.f32.gmra.mxu0 %v2069_v14  ;;  %v948_v13 = vld [vmem:[#allocation4 + $0x348] sm:$0xff] }
  0xba   : > { %400 = vmatmul.f32.gmra.mxu3 %v2072_v15  ;;  %514 = vmatpush.msrb.mxu2 %v487_v16  ;;  %v1175_v16 = vld [vmem:[#allocation4 + $0x450] sm:$0xff] }
  0xbb   : > { %627 = vmatpush.msrb.mxu3 %v602_v17  ;;  %736 = vmatpush.msrb.mxu0 %v719_v18  ;;  %v834_v17 = vld [vmem:[#allocation4 + $0x2c8] sm:$0xff]  ;;  %v2087_v18 = vld [vmem:[#allocation2 + $0x31] sm:$0xff] }
  0xbc   : > { %417 = vmatpush.msrb.mxu1 %v293_v21  ;;  %515 = vmatpush.msrb.mxu2 %v486_v22  ;;  %v2090_v21 = vld [vmem:[#allocation2 + $0x4f] sm:$0xff]  ;;  %v947_v22 = vld [vmem:[#allocation4 + $0x340] sm:$0xff] }
  0xbd   : > { %628 = vmatpush.msrb.mxu3 %v601_v24  ;;  %737 = vmatpush.msrb.mxu0 %v718_v25  ;;  %v1060_v24 = vld [vmem:[#allocation4 + $0x3c0] sm:$0xff]  ;;  %v1174_v25 = vld [vmem:[#allocation4 + $0x448] sm:$0xff] }
  0xbe   : > { %418 = vmatpush.msrb.mxu1 %v292_v26  ;;  %516 = vmatpush.msrb.mxu2 %v485_v27  ;;  %v833_v26 = vld [vmem:[#allocation4 + $0x2c0] sm:$0xff]  ;;  %v2094_v27 = vld [vmem:[#allocation2 + $0x49] sm:$0xff] }
  0xbf   : > { %629 = vmatpush.msrb.mxu3 %v600_v28  ;;  %738 = vmatpush.msrb.mxu0 %v717_v29  ;;  %v2097_v28 = vld [vmem:[#allocation2 + $0x67] sm:$0xff]  ;;  %v946_v29 = vld [vmem:[#allocation4 + $0x338] sm:$0xff] }
  0xc0   : > { %419 = vmatpush.msrb.mxu1 %v291_v30  ;;  %517 = vmatmul.f32.vlgmr.msrb.gmra.mxu2 %v469_v31  ;;  %v1059_v30 = vld [vmem:[#allocation4 + $0x3b8] sm:$0xff]  ;;  %v1173_v31 = vld [vmem:[#allocation4 + $0x440] sm:$0xff] }
  0xc1   : > { %420 = vmatmul.f32.vlgmr.msrb.gmra.mxu1 %v275_v32  ;;  %630 = vmatpush.msrb.mxu3 %v599_v33  ;;  %v832_v32 = vld [vmem:[#allocation4 + $0x2b8] sm:$0xff] }
  0xc2   : > { %739 = vmatpush.msrb.mxu0 %v716_v36  ;;  %955 = vmatpush.msra.mxu2 %v954_v37  ;;  %v2102_v33 = vld [vmem:[#allocation2 + $0x51] sm:$0xff] }
  0xc3   : > { %364 = vmatmul.f32.gmra.mxu0 %v2076_v38  ;;  %631 = vmatmul.f32.vlgmr.msrb.gmra.mxu3 %v583_v40  ;;  %v2105_v36 = vld [vmem:[#allocation2 + $0x6f] sm:$0xff] }
  0xc4   : > { %740 = vmatpush.msrb.mxu0 %v715_v41  ;;  %1068 = vmatpush.msra.mxu3 %v1067_v42  ;;  %v945_v37 = vld [vmem:[#allocation4 + $0x330] sm:$0xff] }
  0xc5   : > { %841 = vmatpush.msra.mxu1 %v840_v43  ;;  %956 = vmatpush.msra.mxu2 %v953_v44  ;;  %v831_v41 = vld [vmem:[#allocation4 + $0x2b0] sm:$0xff]  ;;  %v2113_v43 = vld [vmem:[#allocation2 + $0x87] sm:$0xff] }
  0xc6   : > { %741 = vmatpush.msrb.mxu0 %v714_v45  ;;  %1069 = vmatpush.msra.mxu3 %v1066_v46  ;;  %v2110_v42 = vld [vmem:[#allocation2 + $0x69] sm:$0xff] }
  0xc7   : > { %842 = vmatpush.msra.mxu1 %v839_v47  ;;  %957 = vmatpush.msra.mxu2 %v952_v48  ;;  %v944_v44 = vld [vmem:[#allocation4 + $0x328] sm:$0xff]  ;;  %v1171_v46 = vld [vmem:[#allocation4 + $0x430] sm:$0xff] }
  0xc8   : > { %742 = vmatpush.msrb.mxu0 %v713_v49  ;;  %520 = vmatmul.f32.gmra.mxu2 %v470_v50  ;;  %v1057_v45 = vld [vmem:[#allocation4 + $0x3a8] sm:$0xff]  ;;  %v2118_v48 = vld [vmem:[#allocation2 + $0x71] sm:$0xff]  ;;  %v943_v50 = vld [vmem:[#allocation4 + $0x320] sm:$0xff] }
  0xc9   : > { %423 = vmatmul.f32.gmra.mxu1 %v276_v51  ;;  %1070 = vmatpush.msra.mxu3 %v1065_v54  ;;  %v830_v47 = vld [vmem:[#allocation4 + $0x2a8] sm:$0xff]  ;;  %v1056_v51 = vld [vmem:[#allocation4 + $0x3a0] sm:$0xff] }
  0xca   : > { %743 = vmatpush.msrb.mxu0 %v712_v55  ;;  %843 = vmatpush.msra.mxu1 %v838_v56  ;;  %v2121_v49 = vld [vmem:[#allocation2 + $0x8f] sm:$0xff]  ;;  %v829_v55 = vld [vmem:[#allocation4 + $0x2a0] sm:$0xff] }
  0xcb   : > { %634 = vmatmul.f32.gmra.mxu3 %v584_v57  ;;  %744 = vmatmul.f32.vlgmr.msrb.gmra.mxu0 %v2069_v14  ;;  %v1061_v14 = vld [vmem:[#allocation4 + $0x3c8] sm:$0xff] }
  0xcc   : > { %1181 = vmatpush.msra.mxu0 %v1180_v58  ;;  %958 = vmatpush.msra.mxu2 %v951_v60  ;;  %v1170_v54 = vld [vmem:[#allocation4 + $0x428] sm:$0xff]  ;;  %v942_v58 = vld [vmem:[#allocation4 + $0x318] sm:$0xff] }
  0xcd   : > { %1071 = vmatpush.msra.mxu3 %v1064_v61  ;;  %844 = vmatpush.msra.mxu1 %v837_v62  ;;  %v2126_v56 = vld [vmem:[#allocation2 + $0x89] sm:$0xff]  ;;  %v1055_v60 = vld [vmem:[#allocation4 + $0x398] sm:$0xff]  ;;  %v1169_v61 = vld [vmem:[#allocation4 + $0x420] sm:$0xff] }
  0xce   : > { %1182 = vmatpush.msra.mxu0 %v1179_v63  ;;  %959 = vmatpush.msra.mxu2 %v950_v0  ;;  %v828_v62 = vld [vmem:[#allocation4 + $0x298] sm:$0xff]  ;;  %v2137_v0 = vld [vmem:[#allocation2 + $0xaf] sm:$0xff] }
  0xcf   : > { %1072 = vmatpush.msra.mxu3 %v1063_v1  ;;  %845 = vmatpush.msra.mxu1 %v836_v2  ;;  %v2134_v63 = vld [vmem:[#allocation2 + $0x91] sm:$0xff] }
  0xd0   : > { %523 = vmatmul.f32.gmra.mxu2 %v2080_v3  ;;  %1183 = vmatpush.msra.mxu0 %v1178_v4  ;;  %v941_v1 = vld [vmem:[#allocation4 + $0x310] sm:$0xff]  ;;  %v1168_v4 = vld [vmem:[#allocation4 + $0x418] sm:$0xff] }
  0xd1   : > { %426 = vmatmul.f32.gmra.mxu1 %v583_v40  ;;  %960 = vmatpush.msra.mxu2 %v949_v5  ;;  %v1172_v40 = vld [vmem:[#allocation4 + $0x438] sm:$0xff]  ;;  %v1054_v2 = vld [vmem:[#allocation4 + $0x390] sm:$0xff] }
  0xd2   : > { %1184 = vmatpush.msra.mxu0 %v1177_v6  ;;  %1073 = vmatpush.msra.mxu3 %v1062_v7  ;;  %v827_v5 = vld [vmem:[#allocation4 + $0x290] sm:$0xff]  ;;  %v2145_v7 = vld [vmem:[#allocation2 + $0xc7] sm:$0xff] }
  0xd3   : > { %637 = vmatmul.f32.gmra.mxu3 %v2083_v10  ;;  %747 = vmatmul.f32.gmra.mxu0 %v2076_v38  ;;  %v1058_v38 = vld [vmem:[#allocation4 + $0x3b0] sm:$0xff] }
  0xd4   : > { %1185 = vmatpush.msra.mxu0 %v1176_v11  ;;  %846 = vmatpush.msra.mxu1 %v835_v12  ;;  %v2142_v6 = vld [vmem:[#allocation2 + $0xa9] sm:$0xff] }
  0xd5   : > { %961 = vmatpush.msra.mxu2 %v948_v13  ;;  %1074 = vmatpush.msra.mxu3 %v1061_v14  ;;  %v940_v11 = vld [vmem:[#allocation4 + $0x308] sm:$0xff]  ;;  %v1167_v13 = vld [vmem:[#allocation4 + $0x410] sm:$0xff] }
  0xd6   : > { %1186 = vmatpush.msra.mxu0 %v1175_v16  ;;  %847 = vmatpush.msra.mxu1 %v834_v17  ;;  %v1053_v12 = vld [vmem:[#allocation4 + $0x388] sm:$0xff]  ;;  %v2150_v16 = vld [vmem:[#allocation2 + $0xb1] sm:$0xff] }
  0xd7   : > { %962 = vmatpush.msra.mxu2 %v947_v22  ;;  %1075 = vmatpush.msra.mxu3 %v1060_v24  ;;  %v826_v14 = vld [vmem:[#allocation4 + $0x288] sm:$0xff]  ;;  %v939_v24 = vld [vmem:[#allocation4 + $0x300] sm:$0xff] }
  0xd8   : > { %526 = vmatmul.f32.gmra.mxu2 %v2087_v18  ;;  %1187 = vmatpush.msra.mxu0 %v1174_v25  ;;  %v2153_v17 = vld [vmem:[#allocation2 + $0xcf] sm:$0xff]  ;;  %v1052_v25 = vld [vmem:[#allocation4 + $0x380] sm:$0xff] }
  0xd9   : > { %429 = vmatmul.f32.gmra.mxu1 %v584_v57  ;;  %963 = vmatpush.msra.mxu2 %v946_v29  ;;  %v2129_v57 = vld [vmem:[#allocation2 + $0xa7] sm:$0xff] }
  0xda   : > { %848 = vmatpush.msra.mxu1 %v833_v26  ;;  %1076 = vmatpush.msra.mxu3 %v1059_v30  ;;  %v1166_v26 = vld [vmem:[#allocation4 + $0x408] sm:$0xff]  ;;  %v825_v29 = vld [vmem:[#allocation4 + $0x280] sm:$0xff] }
  0xdb   : > { %640 = vmatmul.f32.gmra.mxu3 %v2090_v21  ;;  %750 = vmatmul.f32.gmra.mxu0 %v2037_v19  ;;  %v2160_v30 = vld [vmem:[#allocation2 + $0xc9] sm:$0xff] }
  0xdc   : > { %1188 = vmatpush.msra.mxu0 %v1173_v31  ;;  %849 = vmatpush.msra.mxu1 %v832_v32  ;;  %v2165_v32 = vld [vmem:[#allocation2 + $0xe7] sm:$0xff] }
  0xdd   : > { %964 = vmatpush.msra.mxu2 %v945_v37  ;;  %1077 = vmatpush.msra.mxu3 %v1058_v38 }
  0xde   : > { %1189 = vmatpush.msra.mxu0 %v1172_v40  ;;  %850 = vmatpush.msra.mxu1 %v831_v41  ;;  %v1165_v40 = vld [vmem:[#allocation4 + $0x400] sm:$0xff]  ;;  %v2174_v41 = vld [vmem:[#allocation2 + $0xd1] sm:$0xff] }
  0xdf   : > { %965 = vmatpush.msra.mxu2 %v944_v44  ;;  %1078 = vmatpush.msra.mxu3 %v1057_v45  ;;  %v2179_v45 = vld [vmem:[#allocation2 + $0xef] sm:$0xff] }
  0xe0   : > { %529 = vmatmul.f32.gmra.mxu2 %v2094_v27  ;;  %1190 = vmatpush.msra.mxu0 %v1171_v46 }
  0xe1   : > { %432 = vmatmul.f32.gmra.mxu1 %v2083_v10  ;;  %966 = vmatpush.msra.mxu2 %v943_v50  ;;  %v2188_v50 = vld [vmem:[#allocation2 + $0xe9] sm:$0xff] }
  0xe2   : > { %851 = vmatpush.msra.mxu1 %v830_v47  ;;  %1079 = vmatpush.msra.mxu3 %v1056_v51 }
  0xe3   : > { %643 = vmatmul.f32.gmra.mxu3 %v2097_v28  ;;  %753 = vmatmul.f32.gmra.mxu0 %v2048_v35 }
  0xe4   : > { %1191 = vmatpush.msra.mxu0 %v1170_v54  ;;  %852 = vmatpush.msra.mxu1 %v829_v55  ;;  %v2193_v54 = vld [vmem:[#allocation2 + $0x107] sm:$0xff] }
  0xe5   : > { %967 = vmatpush.msra.mxu2 %v942_v58  ;;  %1080 = vmatpush.msra.mxu3 %v1055_v60 }
  0xe6   : > { %1192 = vmatpush.msra.mxu0 %v1169_v61  ;;  %853 = vmatpush.msra.mxu1 %v828_v62  ;;  %v2205_v61 = vld [vmem:[#allocation2 + $0x10f] sm:$0xff] }
  0xe7   : > { %968 = vmatpush.msra.mxu2 %v941_v1  ;;  %1081 = vmatpush.msra.mxu3 %v1054_v2  ;;  %v2207_v62 = vld [vmem:[#allocation2 + $0x108] sm:$0xff] }
  0xe8   : > { %532 = vmatmul.f32.gmra.mxu2 %v2102_v33  ;;  %1193 = vmatpush.msra.mxu0 %v1168_v4 }
  0xe9   : > { %435 = vmatmul.f32.gmra.mxu1 %v2090_v21  ;;  %969 = vmatpush.msra.mxu2 %v940_v11  ;;  %v2217_v11 = vld [vmem:[#allocation2 + $0x110] sm:$0xff] }
  0xea   : > { %854 = vmatpush.msra.mxu1 %v827_v5  ;;  %1082 = vmatpush.msra.mxu3 %v1053_v12 }
  0xeb   : > { %646 = vmatmul.f32.gmra.mxu3 %v2105_v36  ;;  %756 = vmatmul.f32.gmra.mxu0 %v2057_v53 }
  0xec   : > { %1194 = vmatpush.msra.mxu0 %v1167_v13  ;;  %855 = vmatpush.msra.mxu1 %v826_v14 }
  0xed   : > { %970 = vmatpush.msra.mxu2 %v939_v24  ;;  %1083 = vmatpush.msra.mxu3 %v1052_v25 }
  0xee   : > { %1195 = vmatpush.msra.mxu0 %v1166_v26  ;;  %856 = vmatpush.msra.mxu1 %v825_v29 }
  0xf0   : > { %535 = vmatmul.f32.gmra.mxu2 %v2110_v42  ;;  %1196 = vmatpush.msra.mxu0 %v1165_v40 }
  0xf1   : > { %438 = vmatmul.f32.gmra.mxu1 %v2097_v28 }
  0xf3   : > { %649 = vmatmul.f32.gmra.mxu3 %v2113_v43  ;;  %759 = vmatmul.f32.gmra.mxu0 %v2066_v9 }
  0xf8   : > { %538 = vmatmul.f32.gmra.mxu2 %v2118_v48 }
  0xf9   : > { %441 = vmatmul.f32.gmra.mxu1 %v2105_v36 }
  0xfb   : > { %652 = vmatmul.f32.gmra.mxu3 %v2121_v49  ;;  %762 = vmatmul.f32.gmra.mxu0 %v2039_v20 }
 0x100   : > { %541 = vmatmul.f32.gmra.mxu2 %v2126_v56 }
 0x101   : > { %444 = vmatmul.f32.gmra.mxu1 %v2113_v43 }
 0x103   : > { %655 = vmatmul.f32.gmra.mxu3 %v2129_v57  ;;  %765 = vmatmul.f32.gmra.mxu0 %v2046_v34 }
 0x108   : > { %544 = vmatmul.f32.gmra.mxu2 %v2134_v63 }
 0x109   : > { %447 = vmatmul.f32.gmra.mxu1 %v2121_v49 }
 0x10b   : > { %658 = vmatmul.f32.gmra.mxu3 %v2137_v0  ;;  %768 = vmatmul.f32.gmra.mxu0 %v2055_v52 }
 0x110   : > { %547 = vmatmul.f32.gmra.mxu2 %v2142_v6 }
 0x111   : > { %450 = vmatmul.f32.gmra.mxu1 %v2129_v57 }
 0x113   : > { %661 = vmatmul.f32.gmra.mxu3 %v2145_v7  ;;  %771 = vmatmul.f32.gmra.mxu0 %v2064_v8 }
 0x118   : > { %550 = vmatmul.f32.gmra.mxu2 %v2150_v16  ;;  %v2155_v22 = vpop.f32.mrf.mxu1 }
 0x119   : > { %453 = vmatmul.f32.gmra.mxu1 %v2137_v0 }
 0x11b   : > { %664 = vmatmul.f32.gmra.mxu3 %v2153_v17  ;;  %774 = vmatmul.f32.gmra.mxu0 %v2041_v23 }
 0x11e   : > { %v2162_v31 = vpop.f32.mrf.mxu2  ;;  %v356_v23 = vpop.f32.mrf.mxu0 }
 0x120   : > { %553 = vmatmul.f32.gmra.mxu2 %v2160_v30  ;;  %v2167_v37 = vpop.f32.mrf.mxu3 }
 0x121   : > { %456 = vmatmul.f32.gmra.mxu1 %v2145_v7  ;;  %v2170_v38 = vpop.f32.mrf.mxu1 }
 0x123   : > { %667 = vmatmul.f32.gmra.mxu3 %v2165_v32  ;;  %777 = vmatmul.f32.gmra.mxu0 %v2051_v39 }
 0x126   : > { %v2176_v44 = vpop.f32.mrf.mxu2 }
 0x128   : > { %556 = vmatmul.f32.gmra.mxu2 %v2174_v41 }
 0x129   : > { %459 = vmatmul.f32.gmra.mxu1 %v2153_v17  ;;  %v2182_v46 = vpop.f32.mrf.mxu3 }
 0x12a   : > { %v2184_v47 = vpop.f32.mrf.mxu1 }
 0x12b   : > { %670 = vmatmul.f32.gmra.mxu3 %v2179_v45  ;;  %780 = vmatmul.f32.gmra.mxu0 %v2061_v59  ;;  %v2202_v59 = vld [vmem:[#allocation2 + $0xf1] sm:$0xff] }
 0x12c   : > { %v359_v39 = vpop.f32.mrf.mxu0 }
 0x12f   : > { %v2190_v51 = vpop.f32.mrf.mxu2 }
 0x130   : > { %559 = vmatmul.f32.gmra.mxu2 %v2188_v50 }
 0x131   : > { %462 = vmatmul.f32.gmra.mxu1 %v2165_v32 }
 0x133   : > { %673 = vmatmul.f32.gmra.mxu3 %v2193_v54  ;;  %783 = vmatmul.f32.gmra.mxu0 %v2072_v15  ;;  %v2198_v55 = vpop.f32.mrf.mxu3 }
 0x134   : > { %v2200_v58 = vpop.f32.mrf.mxu1 }
 0x136   : > { %v362_v60 = vpop.f32.mrf.mxu0 }
 0x138   : > { %562 = vmatmul.f32.gmra.mxu2 %v2202_v59 }
 0x139   : > { %465 = vmatmul.f32.gmra.mxu1 %v2179_v45  ;;  %v2210_v1 = vpop.f32.mrf.mxu2 }
 0x13b   : > { %676 = vmatmul.f32.gmra.mxu3 %v2205_v61  ;;  %786 = vmatmul.f32.gmra.mxu0 %v2207_v62 }
 0x13d   : > { %v2214_v2 = vpop.f32.mrf.mxu3 }
 0x13e   : > { %v421_v4 = vpop.f32.mrf.mxu1 }
 0x13f   : > { %v422_v12 = vadd.f32 %v421_v4, %v356_v23 }
 0x140   : > { %v365_v5 = vpop.f32.mrf.mxu0  ;;  %971 = vmatmul.f32.vlgmr.msra.gmra.mxu2 %v2083_v10 }
 0x141   : > { %857 = vmatmul.f32.vlgmr.msra.gmra.mxu1 %v2080_v3 }
 0x143   : > { %789 = vmatmul.f32.gmra.mxu0 %v2217_v11  ;;  %1084 = vmatmul.f32.vlgmr.msra.gmra.mxu3 %v2037_v19  ;;  %v518_v13 = vpop.f32.mrf.mxu2 }
 0x144   : > { %v566_v14 = vadd.f32 %v518_v13, %v422_v12 }
 0x146   : > { %v424_v24 = vpop.f32.mrf.mxu1  ;;  %v632_v25 = vpop.f32.mrf.mxu3 }
 0x147   : > { %v2222_v26 = vadd.f32 %v632_v25, %v566_v14  ;;  %v425_v10 = vadd.f32 %v424_v24, %v359_v39 }
 0x148   : > { %v2224_v29 = vpop.f32.mrf.mxu0  ;;  %974 = vmatmul.f32.gmra.mxu2 %v2090_v21 }
 0x149   : > { %860 = vmatmul.f32.gmra.mxu1 %v2087_v18 }
 0x14b   : > { %1087 = vmatmul.f32.gmra.mxu3 %v2048_v35  ;;  %1197 = vmatmul.f32.vlgmr.msra.gmra.mxu0 %v2094_v27  ;;  %v521_v3 = vpop.f32.mrf.mxu2 }
 0x14c   : > { %v567_v23 = vadd.f32 %v521_v3, %v425_v10 }
 0x14e   : > { %v427_v19 = vpop.f32.mrf.mxu1  ;;  %v635_v40 = vpop.f32.mrf.mxu3 }
 0x14f   : > { %v2230_v4 = vadd.f32 %v635_v40, %v567_v23  ;;  %v428_v21 = vadd.f32 %v427_v19, %v362_v60 }
 0x150   : > { %v2232_v12 = vpop.f32.mrf.mxu0  ;;  %977 = vmatmul.f32.gmra.mxu2 %v2097_v28 }
 0x151   : > { %863 = vmatmul.f32.gmra.mxu1 %v2094_v27 }
 0x153   : > { %1090 = vmatmul.f32.gmra.mxu3 %v2057_v53  ;;  %1200 = vmatmul.f32.gmra.mxu0 %v2102_v33  ;;  %v524_v35 = vpop.f32.mrf.mxu2 }
 0x154   : > { %v568_v18 = vadd.f32 %v524_v35, %v428_v21 }
 0x156   : > { %v430_v39 = vpop.f32.mrf.mxu1  ;;  %v638_v13 = vpop.f32.mrf.mxu3 }
 0x157   : > { %v2238_v14 = vadd.f32 %v638_v13, %v568_v18  ;;  %v431_v28 = vadd.f32 %v430_v39, %v365_v5 }
 0x158   : > { %v2240_v24 = vpop.f32.mrf.mxu0  ;;  %980 = vmatmul.f32.gmra.mxu2 %v2105_v36 }
 0x159   : > { %866 = vmatmul.f32.gmra.mxu1 %v2102_v33 }
 0x15b   : > { %1093 = vmatmul.f32.gmra.mxu3 %v2066_v9  ;;  %1203 = vmatmul.f32.gmra.mxu0 %v2110_v42  ;;  %v527_v53 = vpop.f32.mrf.mxu2 }
 0x15c   : > { %v569_v27 = vadd.f32 %v527_v53, %v431_v28 }
 0x15e   : > { %v433_v60 = vpop.f32.mrf.mxu1  ;;  %v641_v25 = vpop.f32.mrf.mxu3 }
 0x15f   : > { %v2246_v10 = vadd.f32 %v641_v25, %v569_v27  ;;  %v434_v36 = vadd.f32 %v433_v60, %v2155_v22  ;;  %v1044_v25 = vld [vmem:[#allocation2 + $0xc8] sm:$0xff] }
 0x160   : > { %v2248_v3 = vpop.f32.mrf.mxu0  ;;  %983 = vmatmul.f32.gmra.mxu2 %v2113_v43 }
 0x161   : > { %869 = vmatmul.f32.gmra.mxu1 %v2110_v42 }
 0x163   : > { %1096 = vmatmul.f32.gmra.mxu3 %v2039_v20  ;;  %1206 = vmatmul.f32.gmra.mxu0 %v2118_v48  ;;  %v530_v9 = vpop.f32.mrf.mxu2 }
 0x164   : > { %v570_v33 = vadd.f32 %v530_v9, %v434_v36 }
 0x166   : > { %v436_v5 = vpop.f32.mrf.mxu1  ;;  %v644_v23 = vpop.f32.mrf.mxu3 }
 0x167   : > { %v2255_v19 = vadd.f32 %v644_v23, %v570_v33  ;;  %v437_v42 = vadd.f32 %v436_v5, %v2170_v38  ;;  %v1045_v5 = vld [vmem:[#allocation2 + $0xd0] sm:$0xff] }
 0x168   : > { %v2257_v40 = vpop.f32.mrf.mxu0  ;;  %986 = vmatmul.f32.gmra.mxu2 %v2121_v49 }
 0x169   : > { %872 = vmatmul.f32.gmra.mxu1 %v2118_v48 }
 0x16b   : > { %1099 = vmatmul.f32.gmra.mxu3 %v2046_v34  ;;  %1209 = vmatmul.f32.gmra.mxu0 %v2126_v56  ;;  %v533_v20 = vpop.f32.mrf.mxu2 }
 0x16c   : > { %v571_v43 = vadd.f32 %v533_v20, %v437_v42 }
 0x16e   : > { %v439_v22 = vpop.f32.mrf.mxu1  ;;  %v647_v21 = vpop.f32.mrf.mxu3 }
 0x16f   : > { %v2264_v35 = vadd.f32 %v647_v21, %v571_v43  ;;  %v440_v48 = vadd.f32 %v439_v22, %v2184_v47  ;;  %v1046_v21 = vld [vmem:[#allocation2 + $0xe8] sm:$0xff] }
 0x170   : > { %v2266_v18 = vpop.f32.mrf.mxu0  ;;  %989 = vmatmul.f32.gmra.mxu2 %v2129_v57 }
 0x171   : > { %875 = vmatmul.f32.gmra.mxu1 %v2126_v56 }
 0x173   : > { %1102 = vmatmul.f32.gmra.mxu3 %v2055_v52  ;;  %1212 = vmatmul.f32.gmra.mxu0 %v2134_v63  ;;  %v536_v34 = vpop.f32.mrf.mxu2 }
 0x174   : > { %v572_v49 = vadd.f32 %v536_v34, %v440_v48 }
 0x176   : > { %v442_v38 = vpop.f32.mrf.mxu1  ;;  %v650_v39 = vpop.f32.mrf.mxu3 }
 0x177   : > { %v2273_v13 = vadd.f32 %v650_v39, %v572_v49  ;;  %v443_v56 = vadd.f32 %v442_v38, %v2200_v58 }
 0x178   : > { %v2275_v28 = vpop.f32.mrf.mxu0  ;;  %992 = vmatmul.f32.gmra.mxu2 %v2137_v0 }
 0x179   : > { %878 = vmatmul.f32.gmra.mxu1 %v2134_v63 }
 0x17b   : > { %1105 = vmatmul.f32.gmra.mxu3 %v2064_v8  ;;  %1215 = vmatmul.f32.gmra.mxu0 %v2142_v6  ;;  %v539_v52 = vpop.f32.mrf.mxu2 }
 0x17c   : > { %v573_v57 = vadd.f32 %v539_v52, %v443_v56 }
 0x17e   : > { %v445_v47 = vpop.f32.mrf.mxu1  ;;  %v653_v53 = vpop.f32.mrf.mxu3 }
 0x17f   : > { %v2282_v27 = vadd.f32 %v653_v53, %v573_v57  ;;  %v446_v63 = vadd.f32 %v445_v47, %v2162_v31 }
 0x180   : > { %v2284_v60 = vpop.f32.mrf.mxu0  ;;  %995 = vmatmul.f32.gmra.mxu2 %v2145_v7 }
 0x181   : > { %881 = vmatmul.f32.gmra.mxu1 %v2142_v6 }
 0x183   : > { %1108 = vmatmul.f32.gmra.mxu3 %v1044_v25  ;;  %1218 = vmatmul.f32.gmra.mxu0 %v2150_v16  ;;  %v542_v8 = vpop.f32.mrf.mxu2 }
 0x184   : > { %v574_v0 = vadd.f32 %v542_v8, %v446_v63 }
 0x186   : > { %v448_v58 = vpop.f32.mrf.mxu1  ;;  %v656_v36 = vpop.f32.mrf.mxu3 }
 0x187   : > { %v688_v9 = vadd.f32 %v656_v36, %v574_v0  ;;  %v449_v6 = vadd.f32 %v448_v58, %v2176_v44  ;;  %v1161_v58 = vld [vmem:[#allocation2 + $0x109] sm:$0xff] }
 0x188   : > { %v769_v33 = vpop.f32.mrf.mxu0  ;;  %998 = vmatmul.f32.gmra.mxu2 %v2153_v17  ;;  %v937_v36 = vld [vmem:[#allocation2 + $0x127] sm:$0xff] }
 0x189   : > { %v2291_v23 = vadd.f32 %v769_v33, %v688_v9  ;;  %884 = vmatmul.f32.gmra.mxu1 %v2150_v16 }
 0x18b   : > { %1111 = vmatmul.f32.gmra.mxu3 %v1045_v5  ;;  %1221 = vmatmul.f32.gmra.mxu0 %v2160_v30  ;;  %v545_v7 = vpop.f32.mrf.mxu2 }
 0x18c   : > { %v575_v31 = vadd.f32 %v545_v7, %v449_v6  ;;  %v1050_v7 = vld [vmem:[#allocation2 + $0x128] sm:$0xff] }
 0x18e   : > { %v451_v42 = vpop.f32.mrf.mxu1  ;;  %v659_v20 = vpop.f32.mrf.mxu3 }
 0x18f   : > { %v689_v43 = vadd.f32 %v659_v20, %v575_v31  ;;  %v452_v16 = vadd.f32 %v451_v42, %v2190_v51  ;;  %v938_v42 = vld [vmem:[#allocation2 + $0x12f] sm:$0xff] }
 0x190   : > { %v772_v22 = vpop.f32.mrf.mxu0  ;;  %1001 = vmatmul.f32.gmra.mxu2 %v2165_v32 }
 0x191   : > { %v2297_v17 = vadd.f32 %v772_v22, %v689_v43  ;;  %887 = vmatmul.f32.gmra.mxu1 %v2160_v30 }
 0x193   : > { %1114 = vmatmul.f32.gmra.mxu3 %v1046_v21  ;;  %1224 = vmatmul.f32.gmra.mxu0 %v2174_v41  ;;  %v548_v44 = vpop.f32.mrf.mxu2 }
 0x194   : > { %v576_v48 = vadd.f32 %v548_v44, %v452_v16  ;;  %v1051_v16 = vld [vmem:[#allocation2 + $0x130] sm:$0xff] }
 0x195   : > { %v1163_v44 = vld [vmem:[#allocation2 + $0x129] sm:$0xff] }
 0x196   : > { %v454_v34 = vpop.f32.mrf.mxu1  ;;  %v662_v49 = vpop.f32.mrf.mxu3 }
 0x197   : > { %v690_v38 = vadd.f32 %v662_v49, %v576_v48  ;;  %v455_v32 = vadd.f32 %v454_v34, %v2210_v1 }
 0x198   : > { %v775_v39 = vpop.f32.mrf.mxu0  ;;  %1004 = vmatmul.f32.gmra.mxu2 %v2179_v45 }
 0x199   : > { %v2303_v56 = vadd.f32 %v775_v39, %v690_v38  ;;  %890 = vmatmul.f32.gmra.mxu1 %v2174_v41 }
 0x19b   : > { %1117 = vmatmul.f32.gmra.mxu3 %v2072_v15  ;;  %1227 = vmatmul.f32.gmra.mxu0 %v2188_v50  ;;  %v551_v30 = vpop.f32.mrf.mxu2 }
 0x19c   : > { %v577_v51 = vadd.f32 %v551_v30, %v455_v32  ;;  %v793_v30 = vadd.f32 %v2224_v29, %v2222_v26  ;;  %v794_v26 = vadd.f32 %v2232_v12, %v2230_v4 }
 0x19e   : > { %v457_v52 = vpop.f32.mrf.mxu1  ;;  %v665_v57 = vpop.f32.mrf.mxu3 }
 0x19f   : > { %v691_v47 = vadd.f32 %v665_v57, %v577_v51  ;;  %v458_v41 = vadd.f32 %v457_v52, %v2167_v37  ;;  %v1164_v52 = vld [vmem:[#allocation2 + $0x131] sm:$0xff] }
 0x1a0   : > { %v778_v53 = vpop.f32.mrf.mxu0  ;;  %1007 = vmatmul.f32.gmra.mxu2 %v2193_v54 }
 0x1a1   : > { %v2310_v25 = vadd.f32 %v778_v53, %v691_v47  ;;  %893 = vmatmul.f32.gmra.mxu1 %v2188_v50 }
 0x1a3   : > { %1120 = vmatmul.f32.gmra.mxu3 %v2207_v62  ;;  %1230 = vmatmul.f32.gmra.mxu0 %v2202_v59  ;;  %v554_v15 = vpop.f32.mrf.mxu2 }
 0x1a4   : > { %v578_v45 = vadd.f32 %v554_v15, %v458_v41 }
 0x1a6   : > { %v460_v1 = vpop.f32.mrf.mxu1  ;;  %v668_v63 = vpop.f32.mrf.mxu3 }
 0x1a7   : > { %v692_v8 = vadd.f32 %v668_v63, %v578_v45  ;;  %v461_v50 = vadd.f32 %v460_v1, %v2182_v46  ;;  %v2335_v1 = vld [vmem:[%s2439_s2] ss:$0 sm:$0xff] }
 0x1a8   : > { %v781_v0 = vpop.f32.mrf.mxu0  ;;  %1010 = vmatmul.f32.gmra.mxu2 %v2205_v61  ;;  %v1162_v61 = vld [vmem:[#allocation2 + $0x111] sm:$0xff] }
 0x1a9   : > { %v2317_v54 = vadd.f32 %v781_v0, %v692_v8  ;;  %896 = vmatmul.f32.gmra.mxu1 %v2202_v59 }
 0x1ab   : > { %1123 = vmatmul.f32.gmra.mxu3 %v2217_v11  ;;  %1233 = vmatmul.f32.gmra.mxu0 %v1161_v58  ;;  %v557_v37 = vpop.f32.mrf.mxu2 }
 0x1ac   : > { %v579_v62 = vadd.f32 %v557_v37, %v461_v50 }
 0x1ae   : > { %v463_v9 = vpop.f32.mrf.mxu1  ;;  %v671_v33 = vpop.f32.mrf.mxu3 }
 0x1af   : > { %v693_v5 = vadd.f32 %v671_v33, %v579_v62  ;;  %v464_v59 = vadd.f32 %v463_v9, %v2198_v55  ;;  %v795_v33 = vadd.f32 %v2240_v24, %v2238_v14 }
 0x1b0   : > { %v784_v6 = vpop.f32.mrf.mxu0  ;;  %1013 = vmatmul.f32.gmra.mxu2 %v937_v36 }
 0x1b1   : > { %v2322_v31 = vadd.f32 %v784_v6, %v693_v5  ;;  %899 = vmatmul.f32.gmra.mxu1 %v1161_v58 }
 0x1b3   : > { %1126 = vmatmul.f32.gmra.mxu3 %v1050_v7  ;;  %1236 = vmatmul.f32.gmra.mxu0 %v1162_v61  ;;  %v560_v46 = vpop.f32.mrf.mxu2 }
 0x1b4   : > { %v580_v11 = vadd.f32 %v560_v46, %v464_v59 }
 0x1b6   : > { %v466_v20 = vpop.f32.mrf.mxu1  ;;  %v674_v43 = vpop.f32.mrf.mxu3 }
 0x1b7   : > { %v694_v22 = vadd.f32 %v674_v43, %v580_v11  ;;  %v467_v34 = vadd.f32 %v466_v20, %v2214_v2  ;;  %v796_v20 = vadd.f32 %v2248_v3, %v2246_v10 }
 0x1b8   : > { %v787_v21 = vpop.f32.mrf.mxu0  ;;  %1016 = vmatmul.f32.gmra.mxu2 %v938_v42 }
 0x1b9   : > { %v2325_v48 = vadd.f32 %v787_v21, %v694_v22  ;;  %902 = vmatmul.f32.gmra.mxu1 %v1162_v61 }
 0x1bb   : > { %1129 = vmatmul.f32.gmra.mxu3 %v1051_v16  ;;  %1239 = vmatmul.f32.gmra.mxu0 %v1163_v44  ;;  %v563_v55 = vpop.f32.mrf.mxu2 }
 0x1bc   : > { %v581_v49 = vadd.f32 %v563_v55, %v467_v34 }
 0x1be   : > { %v677_v38 = vpop.f32.mrf.mxu3  ;;  %v858_v39 = vpop.f32.mrf.mxu1 }
 0x1bf   : > { %v695_v32 = vadd.f32 %v677_v38, %v581_v49  ;;  %v906_v47 = vadd.f32 %v858_v39, %v793_v30  ;;  %v797_v38 = vadd.f32 %v2257_v40, %v2255_v19 }
 0x1c0   : > { %v790_v51 = vpop.f32.mrf.mxu0 }
 0x1c1   : > { %v2330_v57 = vadd.f32 %v790_v51, %v695_v32 }
 0x1c3   : > { %1242 = vmatmul.f32.gmra.mxu0 %v1164_v52  ;;  %v972_v53 = vpop.f32.mrf.mxu2 }
 0x1c4   : > { %v1020_v41 = vadd.f32 %v972_v53, %v906_v47 }
 0x1c6   : > { %v861_v2 = vpop.f32.mrf.mxu1  ;;  %v1085_v15 = vpop.f32.mrf.mxu3 }
 0x1c7   : > { %v1133_v45 = vadd.f32 %v1085_v15, %v1020_v41  ;;  %v907_v8 = vadd.f32 %v861_v2, %v794_v26  ;;  %v798_v2 = vadd.f32 %v2266_v18, %v2264_v35 }
 0x1c8   : > { %v1198_v29 = vpop.f32.mrf.mxu0 }
 0x1c9   : > { %v1246_v63 = vadd.f32 %v1198_v29, %v1133_v45 }
 0x1cb   : > { %v1266_v0 = vadd.f32 %v2335_v1, %v1246_v63  ;;  %v975_v58 = vpop.f32.mrf.mxu2 }
 0x1cc   : > { %v1021_v50 = vadd.f32 %v975_v58, %v907_v8 }
 0x1cd   : > { %v1282_v37 = vmax.f32 %v1266_v0, 0.0 }
 0x1ce   : > { %v864_v62 = vpop.f32.mrf.mxu1  ;;  %v1088_v36 = vpop.f32.mrf.mxu3 }
 0x1cf   : > { %1298 = vst [vmem:[%s2025_s23] sm:$0xff] %v1282_v37  ;;  %v1134_v9 = vadd.f32 %v1088_v36, %v1021_v50  ;;  %v908_v7 = vadd.f32 %v864_v62, %v795_v33  ;;  %v799_v50 = vadd.f32 %v2275_v28, %v2273_v13 }
 0x1d0   : > { %v1201_v5 = vpop.f32.mrf.mxu0 }
 0x1d1   : > { %v1247_v6 = vadd.f32 %v1201_v5, %v1134_v9 }
 0x1d3   : > { %v1267_v4 = vadd.f32 %v2335_v1, %v1247_v6  ;;  %v978_v12 = vpop.f32.mrf.mxu2 }
 0x1d4   : > { %v1022_v61 = vadd.f32 %v978_v12, %v908_v7 }
 0x1d5   : > { %v1283_v59 = vmax.f32 %v1267_v4, 0.0  ;;  %v800_v4 = vadd.f32 %v2284_v60, %v2282_v27 }
 0x1d6   : > { %v867_v46 = vpop.f32.mrf.mxu1  ;;  %v1091_v11 = vpop.f32.mrf.mxu3 }
 0x1d7   : > { %1299 = vst [vmem:[%s2025_s23 + $0x8] sm:$0xff] %v1283_v59  ;;  %v1135_v42 = vadd.f32 %v1091_v11, %v1022_v61  ;;  %v909_v21 = vadd.f32 %v867_v46, %v796_v20 }
 0x1d8   : > { %v1204_v43 = vpop.f32.mrf.mxu0 }
 0x1d9   : > { %v1248_v22 = vadd.f32 %v1204_v43, %v1135_v42 }
 0x1db   : > { %v1268_v14 = vadd.f32 %v2335_v1, %v1248_v22  ;;  %v981_v24 = vpop.f32.mrf.mxu2 }
 0x1dc   : > { %v1023_v16 = vadd.f32 %v981_v24, %v909_v21 }
 0x1dd   : > { %v1284_v44 = vmax.f32 %v1268_v14, 0.0 }
 0x1de   : > { %v870_v34 = vpop.f32.mrf.mxu1  ;;  %v1094_v55 = vpop.f32.mrf.mxu3 }
 0x1df   : > { %1300 = vst [vmem:[%s2025_s23 + $0x10] sm:$0xff] %v1284_v44  ;;  %v1136_v49 = vadd.f32 %v1094_v55, %v1023_v16  ;;  %v910_v30 = vadd.f32 %v870_v34, %v797_v38 }
 0x1e0   : > { %v1207_v39 = vpop.f32.mrf.mxu0 }
 0x1e1   : > { %v1249_v32 = vadd.f32 %v1207_v39, %v1136_v49 }
 0x1e3   : > { %v1269_v10 = vadd.f32 %v2335_v1, %v1249_v32  ;;  %v984_v3 = vpop.f32.mrf.mxu2 }
 0x1e4   : > { %v1024_v51 = vadd.f32 %v984_v3, %v910_v30 }
 0x1e5   : > { %v1285_v52 = vmax.f32 %v1269_v10, 0.0 }
 0x1e6   : > { %v873_v47 = vpop.f32.mrf.mxu1  ;;  %v1097_v53 = vpop.f32.mrf.mxu3 }
 0x1e7   : > { %1301 = vst [vmem:[%s2025_s23 + $0x18] sm:$0xff] %v1285_v52  ;;  %v1137_v41 = vadd.f32 %v1097_v53, %v1024_v51  ;;  %v911_v26 = vadd.f32 %v873_v47, %v798_v2 }
 0x1e8   : > { %v1210_v15 = vpop.f32.mrf.mxu0 }
 0x1e9   : > { %v1250_v45 = vadd.f32 %v1210_v15, %v1137_v41 }
 0x1eb   : > { %v1270_v19 = vadd.f32 %v2335_v1, %v1250_v45  ;;  %v987_v40 = vpop.f32.mrf.mxu2 }
 0x1ec   : > { %v1025_v29 = vadd.f32 %v987_v40, %v911_v26 }
 0x1ed   : > { %v1286_v63 = vmax.f32 %v1270_v19, 0.0 }
 0x1ee   : > { %v876_v8 = vpop.f32.mrf.mxu1  ;;  %v1100_v0 = vpop.f32.mrf.mxu3 }
 0x1ef   : > { %1302 = vst [vmem:[%s2025_s23 + $0x20] sm:$0xff] %v1286_v63  ;;  %v1138_v58 = vadd.f32 %v1100_v0, %v1025_v29  ;;  %v912_v36 = vadd.f32 %v876_v8, %v799_v50 }
 0x1f0   : > { %v1213_v37 = vpop.f32.mrf.mxu0 }
 0x1f1   : > { %v1251_v62 = vadd.f32 %v1213_v37, %v1138_v58 }
 0x1f3   : > { %v1271_v35 = vadd.f32 %v2335_v1, %v1251_v62  ;;  %v990_v18 = vpop.f32.mrf.mxu2 }
 0x1f4   : > { %v1026_v9 = vadd.f32 %v990_v18, %v912_v36 }
 0x1f5   : > { %v1287_v33 = vmax.f32 %v1271_v35, 0.0 }
 0x1f6   : > { %v879_v5 = vpop.f32.mrf.mxu1  ;;  %v1103_v6 = vpop.f32.mrf.mxu3 }
 0x1f7   : > { %1303 = vst [vmem:[%s2025_s23 + $0x28] sm:$0xff] %v1287_v33  ;;  %v1139_v7 = vadd.f32 %v1103_v6, %v1026_v9  ;;  %v913_v59 = vadd.f32 %v879_v5, %v800_v4 }
 0x1f8   : > { %v1216_v12 = vpop.f32.mrf.mxu0 }
 0x1f9   : > { %v1252_v61 = vadd.f32 %v1216_v12, %v1139_v7 }
 0x1fb   : > { %v1272_v13 = vadd.f32 %v2335_v1, %v1252_v61  ;;  %v993_v28 = vpop.f32.mrf.mxu2 }
 0x1fc   : > { %v1027_v46 = vadd.f32 %v993_v28, %v913_v59 }
 0x1fd   : > { %v1288_v11 = vmax.f32 %v1272_v13, 0.0 }
 0x1fe   : > { %v882_v42 = vpop.f32.mrf.mxu1  ;;  %v1106_v20 = vpop.f32.mrf.mxu3 }
 0x1ff   : > { %1304 = vst [vmem:[%s2025_s23 + $0x30] sm:$0xff] %v1288_v11  ;;  %v1140_v43 = vadd.f32 %v1106_v20, %v1027_v46  ;;  %v914_v14 = vadd.f32 %v882_v42, %v2291_v23 }
 0x200   : > { %v1219_v22 = vpop.f32.mrf.mxu0 }
 0x201   : > { %v1253_v21 = vadd.f32 %v1219_v22, %v1140_v43 }
 0x203   : > { %v1273_v24 = vadd.f32 %v2335_v1, %v1253_v21  ;;  %v996_v27 = vpop.f32.mrf.mxu2 }
 0x204   : > { %v1028_v60 = vadd.f32 %v996_v27, %v914_v14 }
 0x205   : > { %v1289_v16 = vmax.f32 %v1273_v24, 0.0 }
 0x206   : > { %v885_v44 = vpop.f32.mrf.mxu1  ;;  %v1109_v34 = vpop.f32.mrf.mxu3 }
 0x207   : > { %1305 = vst [vmem:[%s2025_s23 + $0x38] sm:$0xff] %v1289_v16  ;;  %v1141_v55 = vadd.f32 %v1109_v34, %v1028_v60  ;;  %v915_v39 = vadd.f32 %v885_v44, %v2297_v17 }
 0x208   : > { %v1222_v49 = vpop.f32.mrf.mxu0 }
 0x209   : > { %v1254_v38 = vadd.f32 %v1222_v49, %v1141_v55 }
 0x20b   : > { %v1274_v32 = vadd.f32 %v2335_v1, %v1254_v38  ;;  %v999_v30 = vpop.f32.mrf.mxu2 }
 0x20c   : > { %v1029_v10 = vadd.f32 %v999_v30, %v915_v39 }
 0x20d   : > { %v1290_v23 = vmax.f32 %v1274_v32, 0.0 }
 0x20e   : > { %v888_v3 = vpop.f32.mrf.mxu1  ;;  %v1112_v51 = vpop.f32.mrf.mxu3 }
 0x20f   : > { %1306 = vst [vmem:[%s2025_s23 + $0x40] sm:$0xff] %v1290_v23  ;;  %v1142_v52 = vadd.f32 %v1112_v51, %v1029_v10  ;;  %v916_v41 = vadd.f32 %v888_v3, %v2303_v56 }
 0x210   : > { %v1225_v47 = vpop.f32.mrf.mxu0 }
 0x211   : > { %v1255_v53 = vadd.f32 %v1225_v47, %v1142_v52 }
 0x213   : > { %v1275_v2 = vadd.f32 %v2335_v1, %v1255_v53  ;;  %v1002_v15 = vpop.f32.mrf.mxu2 }
 0x214   : > { %v1030_v45 = vadd.f32 %v1002_v15, %v916_v41 }
 0x215   : > { %v1291_v17 = vmax.f32 %v1275_v2, 0.0 }
 0x216   : > { %v891_v26 = vpop.f32.mrf.mxu1  ;;  %v1115_v19 = vpop.f32.mrf.mxu3 }
 0x217   : > { %1307 = vst [vmem:[%s2025_s23 + $0x48] sm:$0xff] %v1291_v17  ;;  %v1143_v40 = vadd.f32 %v1115_v19, %v1030_v45  ;;  %v917_v8 = vadd.f32 %v891_v26, %v2310_v25 }
 0x218   : > { %v1228_v29 = vpop.f32.mrf.mxu0 }
 0x219   : > { %v1256_v63 = vadd.f32 %v1228_v29, %v1143_v40 }
 0x21b   : > { %v1276_v0 = vadd.f32 %v2335_v1, %v1256_v63  ;;  %v1005_v58 = vpop.f32.mrf.mxu2 }
 0x21c   : > { %v1031_v50 = vadd.f32 %v1005_v58, %v917_v8 }
 0x21d   : > { %v1292_v56 = vmax.f32 %v1276_v0, 0.0 }
 0x21e   : > { %v894_v37 = vpop.f32.mrf.mxu1  ;;  %v1118_v62 = vpop.f32.mrf.mxu3 }
 0x21f   : > { %1308 = vst [vmem:[%s2025_s23 + $0x50] sm:$0xff] %v1292_v56  ;;  %v1144_v36 = vadd.f32 %v1118_v62, %v1031_v50  ;;  %v918_v9 = vadd.f32 %v894_v37, %v2317_v54 }
 0x220   : > { %v1231_v35 = vpop.f32.mrf.mxu0 }
 0x221   : > { %v1257_v18 = vadd.f32 %v1231_v35, %v1144_v36 }
 0x223   : > { %v1277_v33 = vadd.f32 %v2335_v1, %v1257_v18  ;;  %v1008_v5 = vpop.f32.mrf.mxu2 }
 0x224   : > { %v1032_v6 = vadd.f32 %v1008_v5, %v918_v9 }
 0x225   : > { %v1293_v25 = vmax.f32 %v1277_v33, 0.0 }
 0x226   : > { %v897_v7 = vpop.f32.mrf.mxu1  ;;  %v1121_v4 = vpop.f32.mrf.mxu3 }
 0x227   : > { %1309 = vst [vmem:[%s2025_s23 + $0x58] sm:$0xff] %v1293_v25  ;;  %v1145_v12 = vadd.f32 %v1121_v4, %v1032_v6  ;;  %v919_v13 = vadd.f32 %v897_v7, %v2322_v31 }
 0x228   : > { %v1234_v61 = vpop.f32.mrf.mxu0 }
 0x229   : > { %v1258_v59 = vadd.f32 %v1234_v61, %v1145_v12 }
 0x22b   : > { %v1278_v28 = vadd.f32 %v2335_v1, %v1258_v59  ;;  %v1011_v46 = vpop.f32.mrf.mxu2 }
 0x22c   : > { %v1033_v54 = vadd.f32 %v1011_v46, %v919_v13 }
 0x22d   : > { %v1294_v11 = vmax.f32 %v1278_v28, 0.0 }
 0x22e   : > { %v900_v42 = vpop.f32.mrf.mxu1  ;;  %v1124_v20 = vpop.f32.mrf.mxu3 }
 0x22f   : > { %1310 = vst [vmem:[%s2025_s23 + $0x60] sm:$0xff] %v1294_v11  ;;  %v1146_v43 = vadd.f32 %v1124_v20, %v1033_v54  ;;  %v920_v14 = vadd.f32 %v900_v42, %v2325_v48 }
 0x230   : > { %v1237_v22 = vpop.f32.mrf.mxu0 }
 0x231   : > { %v1259_v21 = vadd.f32 %v1237_v22, %v1146_v43 }
 0x233   : > { %v1279_v24 = vadd.f32 %v2335_v1, %v1259_v21  ;;  %v1014_v27 = vpop.f32.mrf.mxu2 }
 0x234   : > { %v1034_v31 = vadd.f32 %v1014_v27, %v920_v14 }
 0x235   : > { %v1295_v60 = vmax.f32 %v1279_v24, 0.0 }
 0x236   : > { %v1127_v16 = vpop.f32.mrf.mxu3  ;;  %v903_v44 = vpop.f32.mrf.mxu1 }
 0x237   : > { %1311 = vst [vmem:[%s2025_s23 + $0x68] sm:$0xff] %v1295_v60  ;;  %v1147_v34 = vadd.f32 %v1127_v16, %v1034_v31  ;;  %v921_v38 = vadd.f32 %v903_v44, %v2330_v57 }
 0x238   : > { %v1240_v55 = vpop.f32.mrf.mxu0 }
 0x239   : > { %v1260_v49 = vadd.f32 %v1240_v55, %v1147_v34 }
 0x23b   : > { %v1280_v48 = vadd.f32 %v2335_v1, %v1260_v49  ;;  %v1017_v39 = vpop.f32.mrf.mxu2 }
 0x23c   : > { %v1035_v32 = vadd.f32 %v1017_v39, %v921_v38 }
 0x23d   : > { %v1296_v30 = vmax.f32 %v1280_v48, 0.0 }
 0x23e   : > { %v1130_v10 = vpop.f32.mrf.mxu3 }
 0x23f   : > { %1312 = vst [vmem:[%s2025_s23 + $0x70] sm:$0xff] %v1296_v30  ;;  %v1148_v23 = vadd.f32 %v1130_v10, %v1035_v32 }
 0x240   : > { %v1243_v3 = vpop.f32.mrf.mxu0 }
 0x241   : > { %v1261_v51 = vadd.f32 %v1243_v3, %v1148_v23 }
 0x243   : > { %v1281_v57 = vadd.f32 %v2335_v1, %v1261_v51 }
 0x245   : > { %v1297_v52 = vmax.f32 %v1281_v57, 0.0 }
 0x247   : > { %1313 = vst [vmem:[%s2025_s23 + $0x78] sm:$0xff] %v1297_v52 }
 0x248   : > { %1765 = shalt.err (!%p1762_p11)
}
 0x249   : > { %s1860_s23 = smov 128   ;;  %s1861_s25 = smov 8  }
 0x24a   : > { %1532 = dma.vmem_to_hbm [thread:$0]  (%p1934_p3), %s1331_s30, 2048, %s1333_s5, %s1315_s21, %s1860_s23, %s1860_s23, %s1861_s25  }
 0x24b PF: > { %p1548_p12 = scmp.ge.s32.totalorder %s1846_s19, 2  ;;  %s1347_s28 = sand.u32 1, %s1818_s12  }
 0x24c   : > { %s1348_s1 = scalar_lea.sflag [#allocation6], %s1347_s28 }
 0x24d   : > { %p1539_p13 = pnand %p1548_p12, %p1943_p8 }
 0x24f   : > { %p1540_p0 = pneg %p1539_p13 }
 0x251   : > { %1813 = dma.done.wait (%p1540_p0), %s1348_s1, 2048  }
 0x252   : > { %1815 = vsyncadd (%p1540_p0), %s1348_s1, 4294965248  ;;  %s17_s19 = sadd.s32 1, %s1846_s19   ;;  %s2457_s15 = sld [smem:[#allocation20_spill]] }
 0x253   : > { %p14_p1 = scmp.ge.s32.totalorder %s17_s19, 6   ;;  %s2458_s16 = sld [smem:[#allocation21_spill]] }
 0x254   : > { %s2459_s17 = sld [smem:[#allocation22_spill]]  ;;  %s2461_s12 = smov %s1822_s13 }
 0x255   : > { %s2460_s18 = sld [smem:[#allocation23_spill]]  ;;  %s2462_s13 = smov %s1826_s14 }
 0x256   : > { %s2463_s14 = smov %s1964_s8  ;;  %16 = sbr.rel (!%p14_p1) target bundleno = 8 (0x8), region = 112 }
 0x25b   :  { %1354 = vsyncpa [#allocation5], 1 }
 0x25c   :  { %1356 = vsyncpa [#allocation5 + $0x1], 1 }
 0x25d   :  { %1357 = vsyncpa [#allocation6], 1 }
 0x25e   :  { %1359 = vsyncpa [#allocation6 + $0x1], 1 }
 0x25f   :  { %1360 = vsyncmov [#allocation3] }
 0x262   :  { %s1361_s26 = vpop.sfrf %1360 }
 0x263   :  { %p1467_p3 = scmp.ne.s32.totalorder %s1361_s26, 0 }
 0x265   :  { %1365 = shalt.err (%p1467_p3)  }
 0x266   :  { %1367 = vsyncmov [#allocation3 + $0x1] }
 0x269   :  { %s1368_s27 = vpop.sfrf %1367 }
 0x26a   :  { %p1468_p8 = scmp.ne.s32.totalorder %s1368_s27, 0 }
 0x26c   :  { %1372 = shalt.err (%p1468_p8)  }
 0x26d   :  { %1374 = vsyncmov [#allocation3 + $0x2] }
 0x270   :  { %s1375_s8 = vpop.sfrf %1374 }
 0x271   :  { %p1469_p2 = scmp.ne.s32.totalorder %s1375_s8, 0 }
 0x273   :  { %1379 = shalt.err (%p1469_p2)  }

</bundles_post_ra>
